<compile_context>
chip_gen: v6e
topology: v6e:2x2x1
jax: 0.10.0
libtpu: 0.0.40
codegen_flags: <defaults>
</compile_context>

<pallas_src>
import functools

import numpy as np
import jax
import jax.numpy as jnp
from jax import lax
from jax.experimental import pallas as pl
from jax.experimental.pallas import tpu as pltpu

EPS = 1e-5
NEG_SLOPE = 0.1


def _leaky_relu(v):
    return jnp.where(v > 0, v, NEG_SLOPE * v)


def _bn_packed(y2d, gamma_p, beta_p, inv_count, fold, foldt):
    """Training-mode BatchNorm on (rows, W*C)-packed f32 activations.

    Row-reduce first (sublane reduce), then fold the (1, W*C) row to
    per-channel sums with a tiny matmul; broadcast mean / inv-std back to
    (1, W*C) with another tiny matmul (no lane concats).  All statistics in
    f32, biased variance, eps=1e-5 -> matches nn.BatchNorm2d training mode.
    """
    rowsum = jnp.sum(y2d, axis=0, keepdims=True)                          # (1, W*C)
    rowsq = jnp.sum(y2d * y2d, axis=0, keepdims=True)                     # (1, W*C)
    s1 = jnp.dot(rowsum, fold, preferred_element_type=jnp.float32)        # (1, C)
    s2 = jnp.dot(rowsq, fold, preferred_element_type=jnp.float32)         # (1, C)
    mean = s1 * inv_count
    var = jnp.maximum(s2 * inv_count - mean * mean, 0.0)
    inv_std = lax.rsqrt(var + EPS)                                        # (1, C)
    mean_p = jnp.dot(mean, foldt, preferred_element_type=jnp.float32)     # (1, W*C)
    inv_p = jnp.dot(inv_std, foldt, preferred_element_type=jnp.float32)   # (1, W*C)
    scale_p = gamma_p * inv_p
    shift_p = beta_p - mean_p * scale_p
    return y2d * scale_p + shift_p


def _conv3x3_banded(pad_ref, b_ref, n, h, wc_out):
    """3x3 'same' conv = 3 bf16 MXU matmuls (one per dy row tap), f32 acc.

    pad_ref: (N, H+2, W*Cin) bf16 activations with zero halo rows.
    b_ref:   (3, W*Cin, W*Cout) bf16 banded weights (dx taps + W-boundary
             zero padding folded into the contraction dimension).
    """
    wc_in = pad_ref.shape[-1]
    acc = jnp.zeros((n * h, wc_out), dtype=jnp.float32)
    # TODO(synk): the dy=1/2 slices are sublane-misaligned; a roll-on-output
    # scheme (pltpu.roll on the otherwise-idle XLU slot) or a K-fused single
    # matmul would remove the realignment work once tiled for real sizes.
    for dy in range(3):
        lhs = pad_ref[:, dy:dy + h, :].reshape(n * h, wc_in)   # bf16, no cast
        acc = acc + jnp.dot(lhs, b_ref[dy], preferred_element_type=jnp.float32)
    return acc


def block_kernel(xpad_ref, b1_ref, b2_ref, b3_ref, bsc_ref, gamma_ref, beta_ref,
                 fold_ref, foldt_ref, out_ref, padp_ref, *, width):
    n, hp2, wc_in = xpad_ref.shape
    h = hp2 - 2
    wc_out = out_ref.shape[-1]
    w = width
    inv_count = 1.0 / float(n * h * w)

    fold = fold_ref[...]      # (W*Cout, Cout) f32
    foldt = foldt_ref[...]    # (Cout, W*Cout) f32

    def bn(y2d, i):
        return _bn_packed(y2d, gamma_ref[i:i + 1, :], beta_ref[i:i + 1, :],
                          inv_count, fold, foldt)

    # Zero only the two halo rows of the bf16 intermediate scratch; the
    # interior is always fully overwritten before it is read.
    zrow = jnp.zeros((n, 1, wc_out), jnp.bfloat16)
    padp_ref[:, 0:1, :] = zrow
    padp_ref[:, h + 1:h + 2, :] = zrow

    # conv1 -> bn1 -> leaky_relu(0.1); one f32->bf16 cast on store.
    y = _conv3x3_banded(xpad_ref, b1_ref, n, h, wc_out)
    y = _leaky_relu(bn(y, 0))
    padp_ref[:, 1:h + 1, :] = y.astype(jnp.bfloat16).reshape(n, h, wc_out)

    # conv2 -> bn2 -> leaky_relu(0.1)
    y = _conv3x3_banded(padp_ref, b2_ref, n, h, wc_out)
    y = _leaky_relu(bn(y, 1))
    padp_ref[:, 1:h + 1, :] = y.astype(jnp.bfloat16).reshape(n, h, wc_out)

    # conv3 -> bn3 (no activation); stays f32 for the residual add.
    y = _conv3x3_banded(padp_ref, b3_ref, n, h, wc_out)
    y = bn(y, 2)

    # Shortcut: 1x1 conv (block-diagonal banded weights) -> bn.  x is only read
    # here (already bf16, no cast), so it has no long live range.
    xi = xpad_ref[:, 1:h + 1, :].reshape(n * h, wc_in)
    sc = jnp.dot(xi, bsc_ref[...], preferred_element_type=jnp.float32)
    sc = bn(sc, 3)

    out_ref[...] = (y + sc).reshape(n, h, wc_out)


def basic_block_rn12(x_nchw, params):
    """Forward pass of BasicBlockRN12. x_nchw: (N, Cin, H, W) -> (N, P, H, W)."""
    w1, w2, w3, wsc, gammas, betas = params   # conv weights HWIO; wsc (Cin, Cout)
    n, cin, h, w = x_nchw.shape
    cout = w1.shape[-1]
    wc_in, wc_out = w * cin, w * cout

    # NCHW -> lane-packed (N, H+2, W*Cin) bf16, halo rows padded in the wrapper.
    # TODO(synk): when chaining blocks, keep this packed / halo-padded bf16
    # layout between blocks instead of round-tripping through NCHW f32.
    x = jnp.transpose(x_nchw.astype(jnp.bfloat16), (0, 2, 3, 1)).reshape(n, h, wc_in)
    xpad = jnp.pad(x, ((0, 0), (1, 1), (0, 0)))

    # Banded conv weights: fold the dx taps and the W-direction zero padding
    # into the contraction dim -> one (W*Cin, W*Cout) bf16 matrix per dy tap.
    mask = np.zeros((3, w, w), np.float32)
    for dx in range(3):
        for wo in range(w):
            src = wo + dx - 1
            if 0 <= src < w:
                mask[dx, src, wo] = 1.0

    def banded(wk):
        ci = wk.shape[2]
        b = jnp.einsum('xsw,yxco->yscwo', mask, wk.astype(jnp.float32))
        return b.reshape(3, w * ci, wc_out).astype(jnp.bfloat16)

    b1, b2, b3 = banded(w1), banded(w2), banded(w3)
    bsc = jnp.einsum('sw,co->scwo', np.eye(w, dtype=np.float32),
                     wsc.astype(jnp.float32)).reshape(wc_in, wc_out)
    bsc = bsc.astype(jnp.bfloat16)

    # Trace-time constants: channel fold / broadcast matrices and pre-tiled
    # BN affine parameters.
    fold_np = np.zeros((wc_out, cout), np.float32)
    fold_np[np.arange(wc_out), np.arange(wc_out) % cout] = 1.0
    fold = jnp.asarray(fold_np)              # (W*Cout, Cout)
    foldt = jnp.asarray(np.ascontiguousarray(fold_np.T))   # (Cout, W*Cout)
    gamma_p = jnp.tile(gammas.astype(jnp.float32), (1, w))  # (4, W*Cout)
    beta_p = jnp.tile(betas.astype(jnp.float32), (1, w))    # (4, W*Cout)

    # CostEstimate: flops actually pushed through the MXU by the banded matmuls
    # (larger than the algorithmic conv count), bf16-aware bytes.
    m = n * h
    mxu_flops = 2 * m * (3 * wc_in * wc_out + 6 * wc_out * wc_out + wc_in * wc_out)
    bn_flops = 4 * 8 * wc_out * cout
    out_bytes = 4 * n * h * wc_out
    weight_bytes = 2 * (int(b1.size) + int(b2.size) + int(b3.size) + int(bsc.size))
    const_bytes = 4 * (int(gamma_p.size) + int(beta_p.size)
                       + int(fold.size) + int(foldt.size))
    bytes_accessed = 2 * int(xpad.size) + weight_bytes + const_bytes + out_bytes

    vmem_bytes = (2 * int(xpad.size)                 # bf16 padded input
                  + 2 * n * (h + 2) * wc_out         # bf16 intermediate scratch
                  + out_bytes + weight_bytes + const_bytes)
    # Cap well below v7x's 64 MiB per-TC VMEM to leave headroom for Mosaic's
    # internal scratch; v5e/v6e (128 MiB) are never limited at these shapes.
    vmem_limit = int(min(48 * 1024 * 1024, max(16 * 1024 * 1024, 4 * vmem_bytes)))

    # TODO(synk): add a batch/row grid with dimension_semantics=("parallel",...)
    # plus two-pass BN statistics for real ResNet-12 sizes / v7x dual-TC; a
    # single fully VMEM-resident invocation is best at these toy shapes.
    out = pl.pallas_call(
        functools.partial(block_kernel, width=w),
        out_shape=jax.ShapeDtypeStruct((n, h, wc_out), jnp.float32),
        in_specs=[pl.BlockSpec(memory_space=pltpu.MemorySpace.VMEM)] * 9,
        out_specs=pl.BlockSpec(memory_space=pltpu.MemorySpace.VMEM),
        scratch_shapes=[pltpu.VMEM((n, h + 2, wc_out), jnp.bfloat16)],
        compiler_params=pltpu.CompilerParams(vmem_limit_bytes=vmem_limit),
        cost_estimate=pl.CostEstimate(flops=int(mxu_flops + bn_flops),
                                      transcendentals=4 * cout,
                                      bytes_accessed=int(bytes_accessed)),
    )(xpad, b1, b2, b3, bsc, gamma_p, beta_p, fold, foldt)

    return jnp.transpose(out.reshape(n, h, w, cout), (0, 3, 1, 2))   # -> NCHW


def reference_forward(x_nchw, params):
    """Pure-JAX f32 reference (same math as the PyTorch module in training mode)."""
    w1, w2, w3, wsc, gammas, betas = params
    x = jnp.transpose(x_nchw, (0, 2, 3, 1)).astype(jnp.float32)
    dn = ('NHWC', 'HWIO', 'NHWC')

    def conv(v, wk):
        return lax.conv_general_dilated(v, wk, (1, 1), 'SAME', dimension_numbers=dn)

    def bn(v, i):
        mean = jnp.mean(v, axis=(0, 1, 2), keepdims=True)
        var = jnp.mean((v - mean) ** 2, axis=(0, 1, 2), keepdims=True)
        return (v - mean) * lax.rsqrt(var + EPS) * gammas[i] + betas[i]

    def lrelu(v):
        return jnp.where(v > 0, v, NEG_SLOPE * v)

    o = lrelu(bn(conv(x, w1), 0))
    o = lrelu(bn(conv(o, w2), 1))
    o = bn(conv(o, w3), 2)
    sc = bn(jnp.einsum('nhwc,cd->nhwd', x, wsc), 3)
    return jnp.transpose(o + sc, (0, 3, 1, 2))


if __name__ == "__main__":
    key = jax.random.PRNGKey(0)
    in_planes, planes = 4, 8
    n, hgt, wid = 2, 16, 16

    ks = jax.random.split(key, 7)
    x_nchw = jax.random.normal(ks[0], (n, in_planes, hgt, wid), jnp.float32)
    # Deterministic synthetic parameters (HWIO conv weights, stacked BN params).
    w1 = 0.2 * jax.random.normal(ks[1], (3, 3, in_planes, planes), jnp.float32)
    w2 = 0.2 * jax.random.normal(ks[2], (3, 3, planes, planes), jnp.float32)
    w3 = 0.2 * jax.random.normal(ks[3], (3, 3, planes, planes), jnp.float32)
    wsc = 0.2 * jax.random.normal(ks[4], (in_planes, planes), jnp.float32)
    gammas = 1.0 + 0.1 * jax.random.normal(ks[5], (4, planes), jnp.float32)
    betas = 0.1 * jax.random.normal(ks[6], (4, planes), jnp.float32)
    params = (w1, w2, w3, wsc, gammas, betas)

    out = jax.block_until_ready(basic_block_rn12(x_nchw, params))
    assert out.shape == (n, planes, hgt, wid), out.shape

    ref = reference_forward(x_nchw, params)
    max_err = float(jnp.max(jnp.abs(out - ref)))
    # bf16 MXU operands with f32 accumulation + f32 BN stats: tolerance set for
    # bfloat16 matmul rounding across the three stacked convs (f32 reference).
    assert max_err < 5e-2, f"max abs err {max_err}"

    print("KERNEL_OK")
</pallas_src>

<mosaic_0001>
module attributes {stable_mosaic.version = 11 : i64} {
  func.func @block_kernel(%arg0: memref<2x18x64xbf16, #tpu.memory_space<vmem>>, %arg1: memref<3x64x128xbf16, #tpu.memory_space<vmem>>, %arg2: memref<3x128x128xbf16, #tpu.memory_space<vmem>>, %arg3: memref<3x128x128xbf16, #tpu.memory_space<vmem>>, %arg4: memref<64x128xbf16, #tpu.memory_space<vmem>>, %arg5: memref<4x128xf32, #tpu.memory_space<vmem>>, %arg6: memref<4x128xf32, #tpu.memory_space<vmem>>, %arg7: memref<128x8xf32, #tpu.memory_space<vmem>>, %arg8: memref<8x128xf32, #tpu.memory_space<vmem>>, %arg9: memref<2x16x128xf32, #tpu.memory_space<vmem>>, %arg10: memref<2x18x128xbf16, #tpu.memory_space<vmem>>) attributes {dimension_semantics = [], scalar_prefetch = 0 : i64, scratch_operands = 1 : i64, tpu.core_type = #tpu.core_type<tc>} {
    %c0 = arith.constant 0 : index
    %c0_0 = arith.constant 0 : index
    %0 = vector.load %arg7[%c0, %c0_0] : memref<128x8xf32, #tpu.memory_space<vmem>>, vector<128x8xf32>
    %c0_1 = arith.constant 0 : index
    %c0_2 = arith.constant 0 : index
    %1 = vector.load %arg8[%c0_1, %c0_2] : memref<8x128xf32, #tpu.memory_space<vmem>>, vector<8x128xf32>
    %cst = arith.constant 0.000000e+00 : bf16
    %2 = vector.broadcast %cst : bf16 to vector<2x1x128xbf16>
    %c0_3 = arith.constant 0 : index
    %c0_4 = arith.constant 0 : index
    %c0_5 = arith.constant 0 : index
    %3 = vector.load %arg10[%c0_3, %c0_4, %c0_5] : memref<2x18x128xbf16, #tpu.memory_space<vmem>>, vector<2x1x128xbf16>
    tpu.vector_store %arg10[%c0_3, %c0_4, %c0_5], %2 {strides = array<i32>} : memref<2x18x128xbf16, #tpu.memory_space<vmem>>, vector<2x1x128xbf16>,
    %c0_6 = arith.constant 0 : index
    %c17 = arith.constant 17 : index
    %c0_7 = arith.constant 0 : index
    %4 = vector.load %arg10[%c0_6, %c17, %c0_7] : memref<2x18x128xbf16, #tpu.memory_space<vmem>>, vector<2x1x128xbf16>
    tpu.vector_store %arg10[%c0_6, %c17, %c0_7], %2 {strides = array<i32>} : memref<2x18x128xbf16, #tpu.memory_space<vmem>>, vector<2x1x128xbf16>,
    %cst_8 = arith.constant 0.000000e+00 : f32
    %5 = vector.broadcast %cst_8 : f32 to vector<32x128xf32>
    %c0_9 = arith.constant 0 : index
    %c0_10 = arith.constant 0 : index
    %c0_11 = arith.constant 0 : index
    %6 = vector.load %arg0[%c0_9, %c0_10, %c0_11] : memref<2x18x64xbf16, #tpu.memory_space<vmem>>, vector<2x16x64xbf16>
    %7 = vector.shape_cast %6 : vector<2x16x64xbf16> to vector<32x64xbf16>
    %c0_12 = arith.constant 0 : index
    %c0_13 = arith.constant 0 : index
    %c0_14 = arith.constant 0 : index
    %8 = vector.load %arg1[%c0_12, %c0_13, %c0_14] : memref<3x64x128xbf16, #tpu.memory_space<vmem>>, vector<1x64x128xbf16>
    %9 = vector.shape_cast %8 : vector<1x64x128xbf16> to vector<64x128xbf16>
    %cst_15 = arith.constant dense<0.000000e+00> : vector<32x128xf32>
    %10 = tpu.matmul %7, %9, %cst_15 {dimension_numbers = #tpu.dot_dimension_numbers<[1], [0], [0], [1], [0, 0, 1, 1], [], []>} : vector<32x64xbf16>, vector<64x128xbf16>, vector<32x128xf32> -> vector<32x128xf32>
    %11 = arith.addf %5, %10 : vector<32x128xf32>
    %c0_16 = arith.constant 0 : index
    %c1 = arith.constant 1 : index
    %c0_17 = arith.constant 0 : index
    %12 = vector.load %arg0[%c0_16, %c1, %c0_17] : memref<2x18x64xbf16, #tpu.memory_space<vmem>>, vector<2x16x64xbf16>
    %13 = vector.shape_cast %12 : vector<2x16x64xbf16> to vector<32x64xbf16>
    %c1_18 = arith.constant 1 : index
    %c0_19 = arith.constant 0 : index
    %c0_20 = arith.constant 0 : index
    %14 = vector.load %arg1[%c1_18, %c0_19, %c0_20] : memref<3x64x128xbf16, #tpu.memory_space<vmem>>, vector<1x64x128xbf16>
    %15 = vector.shape_cast %14 : vector<1x64x128xbf16> to vector<64x128xbf16>
    %cst_21 = arith.constant dense<0.000000e+00> : vector<32x128xf32>
    %16 = tpu.matmul %13, %15, %cst_21 {dimension_numbers = #tpu.dot_dimension_numbers<[1], [0], [0], [1], [0, 0, 1, 1], [], []>} : vector<32x64xbf16>, vector<64x128xbf16>, vector<32x128xf32> -> vector<32x128xf32>
    %17 = arith.addf %11, %16 : vector<32x128xf32>
    %c0_22 = arith.constant 0 : index
    %c2 = arith.constant 2 : index
    %c0_23 = arith.constant 0 : index
    %18 = vector.load %arg0[%c0_22, %c2, %c0_23] : memref<2x18x64xbf16, #tpu.memory_space<vmem>>, vector<2x16x64xbf16>
    %19 = vector.shape_cast %18 : vector<2x16x64xbf16> to vector<32x64xbf16>
    %c2_24 = arith.constant 2 : index
    %c0_25 = arith.constant 0 : index
    %c0_26 = arith.constant 0 : index
    %20 = vector.load %arg1[%c2_24, %c0_25, %c0_26] : memref<3x64x128xbf16, #tpu.memory_space<vmem>>, vector<1x64x128xbf16>
    %21 = vector.shape_cast %20 : vector<1x64x128xbf16> to vector<64x128xbf16>
    %cst_27 = arith.constant dense<0.000000e+00> : vector<32x128xf32>
    %22 = tpu.matmul %19, %21, %cst_27 {dimension_numbers = #tpu.dot_dimension_numbers<[1], [0], [0], [1], [0, 0, 1, 1], [], []>} : vector<32x64xbf16>, vector<64x128xbf16>, vector<32x128xf32> -> vector<32x128xf32>
    %23 = arith.addf %17, %22 : vector<32x128xf32>
    %c0_28 = arith.constant 0 : index
    %c0_29 = arith.constant 0 : index
    %24 = vector.load %arg5[%c0_28, %c0_29] : memref<4x128xf32, #tpu.memory_space<vmem>>, vector<1x128xf32>
    %c0_30 = arith.constant 0 : index
    %c0_31 = arith.constant 0 : index
    %25 = vector.load %arg6[%c0_30, %c0_31] : memref<4x128xf32, #tpu.memory_space<vmem>>, vector<1x128xf32>
    %cst_32 = arith.constant dense<0.000000e+00> : vector<128xf32>
    %26 = vector.multi_reduction <add>, %23, %cst_32 [0] : vector<32x128xf32> to vector<128xf32>
    %27 = vector.shape_cast %26 : vector<128xf32> to vector<1x128xf32>
    %28 = arith.mulf %23, %23 : vector<32x128xf32>
    %cst_33 = arith.constant dense<0.000000e+00> : vector<128xf32>
    %29 = vector.multi_reduction <add>, %28, %cst_33 [0] : vector<32x128xf32> to vector<128xf32>
    %30 = vector.shape_cast %29 : vector<128xf32> to vector<1x128xf32>
    %cst_34 = arith.constant dense<0.000000e+00> : vector<1x8xf32>
    %31 = tpu.matmul %27, %0, %cst_34 {dimension_numbers = #tpu.dot_dimension_numbers<[1], [0], [0], [1], [0, 0, 1, 1], [], []>} : vector<1x128xf32>, vector<128x8xf32>, vector<1x8xf32> -> vector<1x8xf32>
    %cst_35 = arith.constant dense<0.000000e+00> : vector<1x8xf32>
    %32 = tpu.matmul %30, %0, %cst_35 {dimension_numbers = #tpu.dot_dimension_numbers<[1], [0], [0], [1], [0, 0, 1, 1], [], []>} : vector<1x128xf32>, vector<128x8xf32>, vector<1x8xf32> -> vector<1x8xf32>
    %cst_36 = arith.constant 0.001953125 : f32
    %33 = vector.broadcast %cst_36 : f32 to vector<1x8xf32>
    %34 = arith.mulf %31, %33 : vector<1x8xf32>
    %cst_37 = arith.constant 0.001953125 : f32
    %35 = vector.broadcast %cst_37 : f32 to vector<1x8xf32>
    %36 = arith.mulf %32, %35 : vector<1x8xf32>
    %37 = arith.mulf %34, %34 : vector<1x8xf32>
    %38 = arith.subf %36, %37 : vector<1x8xf32>
    %cst_38 = arith.constant 0.000000e+00 : f32
    %39 = vector.broadcast %cst_38 : f32 to vector<1x8xf32>
    %40 = arith.maximumf %38, %39 : vector<1x8xf32>
    %cst_39 = arith.constant 9.99999974E-6 : f32
    %41 = vector.broadcast %cst_39 : f32 to vector<1x8xf32>
    %42 = arith.addf %40, %41 : vector<1x8xf32>
    %43 = math.rsqrt %42 : vector<1x8xf32>
    %cst_40 = arith.constant dense<0.000000e+00> : vector<1x128xf32>
    %44 = tpu.matmul %34, %1, %cst_40 {dimension_numbers = #tpu.dot_dimension_numbers<[1], [0], [0], [1], [0, 0, 1, 1], [], []>} : vector<1x8xf32>, vector<8x128xf32>, vector<1x128xf32> -> vector<1x128xf32>
    %cst_41 = arith.constant dense<0.000000e+00> : vector<1x128xf32>
    %45 = tpu.matmul %43, %1, %cst_41 {dimension_numbers = #tpu.dot_dimension_numbers<[1], [0], [0], [1], [0, 0, 1, 1], [], []>} : vector<1x8xf32>, vector<8x128xf32>, vector<1x128xf32> -> vector<1x128xf32>
    %46 = arith.mulf %24, %45 : vector<1x128xf32>
    %47 = arith.mulf %44, %46 : vector<1x128xf32>
    %48 = arith.subf %25, %47 : vector<1x128xf32>
    %49 = vector.broadcast %46 : vector<1x128xf32> to vector<32x128xf32>
    %50 = arith.mulf %23, %49 : vector<32x128xf32>
    %51 = vector.broadcast %48 : vector<1x128xf32> to vector<32x128xf32>
    %52 = arith.addf %50, %51 : vector<32x128xf32>
    %cst_42 = arith.constant 0.000000e+00 : f32
    %53 = vector.broadcast %cst_42 : f32 to vector<32x128xf32>
    %54 = arith.cmpf ogt, %52, %53 : vector<32x128xf32>
    %cst_43 = arith.constant 1.000000e-01 : f32
    %55 = vector.broadcast %cst_43 : f32 to vector<32x128xf32>
    %56 = arith.mulf %55, %52 : vector<32x128xf32>
    %57 = arith.select %54, %52, %56 : vector<32x128xi1>, vector<32x128xf32>
    %58 = arith.truncf %57 : vector<32x128xf32> to vector<32x128xbf16>
    %59 = vector.shape_cast %58 : vector<32x128xbf16> to vector<2x16x128xbf16>
    %c0_44 = arith.constant 0 : index
    %c1_45 = arith.constant 1 : index
    %c0_46 = arith.constant 0 : index
    %60 = vector.load %arg10[%c0_44, %c1_45, %c0_46] : memref<2x18x128xbf16, #tpu.memory_space<vmem>>, vector<2x16x128xbf16>
    tpu.vector_store %arg10[%c0_44, %c1_45, %c0_46], %59 {strides = array<i32>} : memref<2x18x128xbf16, #tpu.memory_space<vmem>>, vector<2x16x128xbf16>,
    %cst_47 = arith.constant 0.000000e+00 : f32
    %61 = vector.broadcast %cst_47 : f32 to vector<32x128xf32>
    %c0_48 = arith.constant 0 : index
    %c0_49 = arith.constant 0 : index
    %c0_50 = arith.constant 0 : index
    %62 = vector.load %arg10[%c0_48, %c0_49, %c0_50] : memref<2x18x128xbf16, #tpu.memory_space<vmem>>, vector<2x16x128xbf16>
    %63 = vector.shape_cast %62 : vector<2x16x128xbf16> to vector<32x128xbf16>
    %c0_51 = arith.constant 0 : index
    %c0_52 = arith.constant 0 : index
    %c0_53 = arith.constant 0 : index
    %64 = vector.load %arg2[%c0_51, %c0_52, %c0_53] : memref<3x128x128xbf16, #tpu.memory_space<vmem>>, vector<1x128x128xbf16>
    %65 = vector.shape_cast %64 : vector<1x128x128xbf16> to vector<128x128xbf16>
    %cst_54 = arith.constant dense<0.000000e+00> : vector<32x128xf32>
    %66 = tpu.matmul %63, %65, %cst_54 {dimension_numbers = #tpu.dot_dimension_numbers<[1], [0], [0], [1], [0, 0, 1, 1], [], []>} : vector<32x128xbf16>, vector<128x128xbf16>, vector<32x128xf32> -> vector<32x128xf32>
    %67 = arith.addf %61, %66 : vector<32x128xf32>
    %c0_55 = arith.constant 0 : index
    %c1_56 = arith.constant 1 : index
    %c0_57 = arith.constant 0 : index
    %68 = vector.load %arg10[%c0_55, %c1_56, %c0_57] : memref<2x18x128xbf16, #tpu.memory_space<vmem>>, vector<2x16x128xbf16>
    %69 = vector.shape_cast %68 : vector<2x16x128xbf16> to vector<32x128xbf16>
    %c1_58 = arith.constant 1 : index
    %c0_59 = arith.constant 0 : index
    %c0_60 = arith.constant 0 : index
    %70 = vector.load %arg2[%c1_58, %c0_59, %c0_60] : memref<3x128x128xbf16, #tpu.memory_space<vmem>>, vector<1x128x128xbf16>
    %71 = vector.shape_cast %70 : vector<1x128x128xbf16> to vector<128x128xbf16>
    %cst_61 = arith.constant dense<0.000000e+00> : vector<32x128xf32>
    %72 = tpu.matmul %69, %71, %cst_61 {dimension_numbers = #tpu.dot_dimension_numbers<[1], [0], [0], [1], [0, 0, 1, 1], [], []>} : vector<32x128xbf16>, vector<128x128xbf16>, vector<32x128xf32> -> vector<32x128xf32>
    %73 = arith.addf %67, %72 : vector<32x128xf32>
    %c0_62 = arith.constant 0 : index
    %c2_63 = arith.constant 2 : index
    %c0_64 = arith.constant 0 : index
    %74 = vector.load %arg10[%c0_62, %c2_63, %c0_64] : memref<2x18x128xbf16, #tpu.memory_space<vmem>>, vector<2x16x128xbf16>
    %75 = vector.shape_cast %74 : vector<2x16x128xbf16> to vector<32x128xbf16>
    %c2_65 = arith.constant 2 : index
    %c0_66 = arith.constant 0 : index
    %c0_67 = arith.constant 0 : index
    %76 = vector.load %arg2[%c2_65, %c0_66, %c0_67] : memref<3x128x128xbf16, #tpu.memory_space<vmem>>, vector<1x128x128xbf16>
    %77 = vector.shape_cast %76 : vector<1x128x128xbf16> to vector<128x128xbf16>
    %cst_68 = arith.constant dense<0.000000e+00> : vector<32x128xf32>
    %78 = tpu.matmul %75, %77, %cst_68 {dimension_numbers = #tpu.dot_dimension_numbers<[1], [0], [0], [1], [0, 0, 1, 1], [], []>} : vector<32x128xbf16>, vector<128x128xbf16>, vector<32x128xf32> -> vector<32x128xf32>
    %79 = arith.addf %73, %78 : vector<32x128xf32>
    %c1_69 = arith.constant 1 : index
    %c0_70 = arith.constant 0 : index
    %80 = vector.load %arg5[%c1_69, %c0_70] : memref<4x128xf32, #tpu.memory_space<vmem>>, vector<1x128xf32>
    %c1_71 = arith.constant 1 : index
    %c0_72 = arith.constant 0 : index
    %81 = vector.load %arg6[%c1_71, %c0_72] : memref<4x128xf32, #tpu.memory_space<vmem>>, vector<1x128xf32>
    %cst_73 = arith.constant dense<0.000000e+00> : vector<128xf32>
    %82 = vector.multi_reduction <add>, %79, %cst_73 [0] : vector<32x128xf32> to vector<128xf32>
    %83 = vector.shape_cast %82 : vector<128xf32> to vector<1x128xf32>
    %84 = arith.mulf %79, %79 : vector<32x128xf32>
    %cst_74 = arith.constant dense<0.000000e+00> : vector<128xf32>
    %85 = vector.multi_reduction <add>, %84, %cst_74 [0] : vector<32x128xf32> to vector<128xf32>
    %86 = vector.shape_cast %85 : vector<128xf32> to vector<1x128xf32>
    %cst_75 = arith.constant dense<0.000000e+00> : vector<1x8xf32>
    %87 = tpu.matmul %83, %0, %cst_75 {dimension_numbers = #tpu.dot_dimension_numbers<[1], [0], [0], [1], [0, 0, 1, 1], [], []>} : vector<1x128xf32>, vector<128x8xf32>, vector<1x8xf32> -> vector<1x8xf32>
    %cst_76 = arith.constant dense<0.000000e+00> : vector<1x8xf32>
    %88 = tpu.matmul %86, %0, %cst_76 {dimension_numbers = #tpu.dot_dimension_numbers<[1], [0], [0], [1], [0, 0, 1, 1], [], []>} : vector<1x128xf32>, vector<128x8xf32>, vector<1x8xf32> -> vector<1x8xf32>
    %cst_77 = arith.constant 0.001953125 : f32
    %89 = vector.broadcast %cst_77 : f32 to vector<1x8xf32>
    %90 = arith.mulf %87, %89 : vector<1x8xf32>
    %cst_78 = arith.constant 0.001953125 : f32
    %91 = vector.broadcast %cst_78 : f32 to vector<1x8xf32>
    %92 = arith.mulf %88, %91 : vector<1x8xf32>
    %93 = arith.mulf %90, %90 : vector<1x8xf32>
    %94 = arith.subf %92, %93 : vector<1x8xf32>
    %cst_79 = arith.constant 0.000000e+00 : f32
    %95 = vector.broadcast %cst_79 : f32 to vector<1x8xf32>
    %96 = arith.maximumf %94, %95 : vector<1x8xf32>
    %cst_80 = arith.constant 9.99999974E-6 : f32
    %97 = vector.broadcast %cst_80 : f32 to vector<1x8xf32>
    %98 = arith.addf %96, %97 : vector<1x8xf32>
    %99 = math.rsqrt %98 : vector<1x8xf32>
    %cst_81 = arith.constant dense<0.000000e+00> : vector<1x128xf32>
    %100 = tpu.matmul %90, %1, %cst_81 {dimension_numbers = #tpu.dot_dimension_numbers<[1], [0], [0], [1], [0, 0, 1, 1], [], []>} : vector<1x8xf32>, vector<8x128xf32>, vector<1x128xf32> -> vector<1x128xf32>
    %cst_82 = arith.constant dense<0.000000e+00> : vector<1x128xf32>
    %101 = tpu.matmul %99, %1, %cst_82 {dimension_numbers = #tpu.dot_dimension_numbers<[1], [0], [0], [1], [0, 0, 1, 1], [], []>} : vector<1x8xf32>, vector<8x128xf32>, vector<1x128xf32> -> vector<1x128xf32>
    %102 = arith.mulf %80, %101 : vector<1x128xf32>
    %103 = arith.mulf %100, %102 : vector<1x128xf32>
    %104 = arith.subf %81, %103 : vector<1x128xf32>
    %105 = vector.broadcast %102 : vector<1x128xf32> to vector<32x128xf32>
    %106 = arith.mulf %79, %105 : vector<32x128xf32>
    %107 = vector.broadcast %104 : vector<1x128xf32> to vector<32x128xf32>
    %108 = arith.addf %106, %107 : vector<32x128xf32>
    %cst_83 = arith.constant 0.000000e+00 : f32
    %109 = vector.broadcast %cst_83 : f32 to vector<32x128xf32>
    %110 = arith.cmpf ogt, %108, %109 : vector<32x128xf32>
    %cst_84 = arith.constant 1.000000e-01 : f32
    %111 = vector.broadcast %cst_84 : f32 to vector<32x128xf32>
    %112 = arith.mulf %111, %108 : vector<32x128xf32>
    %113 = arith.select %110, %108, %112 : vector<32x128xi1>, vector<32x128xf32>
    %114 = arith.truncf %113 : vector<32x128xf32> to vector<32x128xbf16>
    %115 = vector.shape_cast %114 : vector<32x128xbf16> to vector<2x16x128xbf16>
    %c0_85 = arith.constant 0 : index
    %c1_86 = arith.constant 1 : index
    %c0_87 = arith.constant 0 : index
    %116 = vector.load %arg10[%c0_85, %c1_86, %c0_87] : memref<2x18x128xbf16, #tpu.memory_space<vmem>>, vector<2x16x128xbf16>
    tpu.vector_store %arg10[%c0_85, %c1_86, %c0_87], %115 {strides = array<i32>} : memref<2x18x128xbf16, #tpu.memory_space<vmem>>, vector<2x16x128xbf16>,
    %cst_88 = arith.constant 0.000000e+00 : f32
    %117 = vector.broadcast %cst_88 : f32 to vector<32x128xf32>
    %c0_89 = arith.constant 0 : index
    %c0_90 = arith.constant 0 : index
    %c0_91 = arith.constant 0 : index
    %118 = vector.load %arg10[%c0_89, %c0_90, %c0_91] : memref<2x18x128xbf16, #tpu.memory_space<vmem>>, vector<2x16x128xbf16>
    %119 = vector.shape_cast %118 : vector<2x16x128xbf16> to vector<32x128xbf16>
    %c0_92 = arith.constant 0 : index
    %c0_93 = arith.constant 0 : index
    %c0_94 = arith.constant 0 : index
    %120 = vector.load %arg3[%c0_92, %c0_93, %c0_94] : memref<3x128x128xbf16, #tpu.memory_space<vmem>>, vector<1x128x128xbf16>
    %121 = vector.shape_cast %120 : vector<1x128x128xbf16> to vector<128x128xbf16>
    %cst_95 = arith.constant dense<0.000000e+00> : vector<32x128xf32>
    %122 = tpu.matmul %119, %121, %cst_95 {dimension_numbers = #tpu.dot_dimension_numbers<[1], [0], [0], [1], [0, 0, 1, 1], [], []>} : vector<32x128xbf16>, vector<128x128xbf16>, vector<32x128xf32> -> vector<32x128xf32>
    %123 = arith.addf %117, %122 : vector<32x128xf32>
    %c0_96 = arith.constant 0 : index
    %c1_97 = arith.constant 1 : index
    %c0_98 = arith.constant 0 : index
    %124 = vector.load %arg10[%c0_96, %c1_97, %c0_98] : memref<2x18x128xbf16, #tpu.memory_space<vmem>>, vector<2x16x128xbf16>
    %125 = vector.shape_cast %124 : vector<2x16x128xbf16> to vector<32x128xbf16>
    %c1_99 = arith.constant 1 : index
    %c0_100 = arith.constant 0 : index
    %c0_101 = arith.constant 0 : index
    %126 = vector.load %arg3[%c1_99, %c0_100, %c0_101] : memref<3x128x128xbf16, #tpu.memory_space<vmem>>, vector<1x128x128xbf16>
    %127 = vector.shape_cast %126 : vector<1x128x128xbf16> to vector<128x128xbf16>
    %cst_102 = arith.constant dense<0.000000e+00> : vector<32x128xf32>
    %128 = tpu.matmul %125, %127, %cst_102 {dimension_numbers = #tpu.dot_dimension_numbers<[1], [0], [0], [1], [0, 0, 1, 1], [], []>} : vector<32x128xbf16>, vector<128x128xbf16>, vector<32x128xf32> -> vector<32x128xf32>
    %129 = arith.addf %123, %128 : vector<32x128xf32>
    %c0_103 = arith.constant 0 : index
    %c2_104 = arith.constant 2 : index
    %c0_105 = arith.constant 0 : index
    %130 = vector.load %arg10[%c0_103, %c2_104, %c0_105] : memref<2x18x128xbf16, #tpu.memory_space<vmem>>, vector<2x16x128xbf16>
    %131 = vector.shape_cast %130 : vector<2x16x128xbf16> to vector<32x128xbf16>
    %c2_106 = arith.constant 2 : index
    %c0_107 = arith.constant 0 : index
    %c0_108 = arith.constant 0 : index
    %132 = vector.load %arg3[%c2_106, %c0_107, %c0_108] : memref<3x128x128xbf16, #tpu.memory_space<vmem>>, vector<1x128x128xbf16>
    %133 = vector.shape_cast %132 : vector<1x128x128xbf16> to vector<128x128xbf16>
    %cst_109 = arith.constant dense<0.000000e+00> : vector<32x128xf32>
    %134 = tpu.matmul %131, %133, %cst_109 {dimension_numbers = #tpu.dot_dimension_numbers<[1], [0], [0], [1], [0, 0, 1, 1], [], []>} : vector<32x128xbf16>, vector<128x128xbf16>, vector<32x128xf32> -> vector<32x128xf32>
    %135 = arith.addf %129, %134 : vector<32x128xf32>
    %c2_110 = arith.constant 2 : index
    %c0_111 = arith.constant 0 : index
    %136 = vector.load %arg5[%c2_110, %c0_111] : memref<4x128xf32, #tpu.memory_space<vmem>>, vector<1x128xf32>
    %c2_112 = arith.constant 2 : index
    %c0_113 = arith.constant 0 : index
    %137 = vector.load %arg6[%c2_112, %c0_113] : memref<4x128xf32, #tpu.memory_space<vmem>>, vector<1x128xf32>
    %cst_114 = arith.constant dense<0.000000e+00> : vector<128xf32>
    %138 = vector.multi_reduction <add>, %135, %cst_114 [0] : vector<32x128xf32> to vector<128xf32>
    %139 = vector.shape_cast %138 : vector<128xf32> to vector<1x128xf32>
    %140 = arith.mulf %135, %135 : vector<32x128xf32>
    %cst_115 = arith.constant dense<0.000000e+00> : vector<128xf32>
    %141 = vector.multi_reduction <add>, %140, %cst_115 [0] : vector<32x128xf32> to vector<128xf32>
    %142 = vector.shape_cast %141 : vector<128xf32> to vector<1x128xf32>
    %cst_116 = arith.constant dense<0.000000e+00> : vector<1x8xf32>
    %143 = tpu.matmul %139, %0, %cst_116 {dimension_numbers = #tpu.dot_dimension_numbers<[1], [0], [0], [1], [0, 0, 1, 1], [], []>} : vector<1x128xf32>, vector<128x8xf32>, vector<1x8xf32> -> vector<1x8xf32>
    %cst_117 = arith.constant dense<0.000000e+00> : vector<1x8xf32>
    %144 = tpu.matmul %142, %0, %cst_117 {dimension_numbers = #tpu.dot_dimension_numbers<[1], [0], [0], [1], [0, 0, 1, 1], [], []>} : vector<1x128xf32>, vector<128x8xf32>, vector<1x8xf32> -> vector<1x8xf32>
    %cst_118 = arith.constant 0.001953125 : f32
    %145 = vector.broadcast %cst_118 : f32 to vector<1x8xf32>
    %146 = arith.mulf %143, %145 : vector<1x8xf32>
    %cst_119 = arith.constant 0.001953125 : f32
    %147 = vector.broadcast %cst_119 : f32 to vector<1x8xf32>
    %148 = arith.mulf %144, %147 : vector<1x8xf32>
    %149 = arith.mulf %146, %146 : vector<1x8xf32>
    %150 = arith.subf %148, %149 : vector<1x8xf32>
    %cst_120 = arith.constant 0.000000e+00 : f32
    %151 = vector.broadcast %cst_120 : f32 to vector<1x8xf32>
    %152 = arith.maximumf %150, %151 : vector<1x8xf32>
    %cst_121 = arith.constant 9.99999974E-6 : f32
    %153 = vector.broadcast %cst_121 : f32 to vector<1x8xf32>
    %154 = arith.addf %152, %153 : vector<1x8xf32>
    %155 = math.rsqrt %154 : vector<1x8xf32>
    %cst_122 = arith.constant dense<0.000000e+00> : vector<1x128xf32>
    %156 = tpu.matmul %146, %1, %cst_122 {dimension_numbers = #tpu.dot_dimension_numbers<[1], [0], [0], [1], [0, 0, 1, 1], [], []>} : vector<1x8xf32>, vector<8x128xf32>, vector<1x128xf32> -> vector<1x128xf32>
    %cst_123 = arith.constant dense<0.000000e+00> : vector<1x128xf32>
    %157 = tpu.matmul %155, %1, %cst_123 {dimension_numbers = #tpu.dot_dimension_numbers<[1], [0], [0], [1], [0, 0, 1, 1], [], []>} : vector<1x8xf32>, vector<8x128xf32>, vector<1x128xf32> -> vector<1x128xf32>
    %158 = arith.mulf %136, %157 : vector<1x128xf32>
    %159 = arith.mulf %156, %158 : vector<1x128xf32>
    %160 = arith.subf %137, %159 : vector<1x128xf32>
    %161 = vector.broadcast %158 : vector<1x128xf32> to vector<32x128xf32>
    %162 = arith.mulf %135, %161 : vector<32x128xf32>
    %163 = vector.broadcast %160 : vector<1x128xf32> to vector<32x128xf32>
    %164 = arith.addf %162, %163 : vector<32x128xf32>
    %c0_124 = arith.constant 0 : index
    %c1_125 = arith.constant 1 : index
    %c0_126 = arith.constant 0 : index
    %165 = vector.load %arg0[%c0_124, %c1_125, %c0_126] : memref<2x18x64xbf16, #tpu.memory_space<vmem>>, vector<2x16x64xbf16>
    %166 = vector.shape_cast %165 : vector<2x16x64xbf16> to vector<32x64xbf16>
    %c0_127 = arith.constant 0 : index
    %c0_128 = arith.constant 0 : index
    %167 = vector.load %arg4[%c0_127, %c0_128] : memref<64x128xbf16, #tpu.memory_space<vmem>>, vector<64x128xbf16>
    %cst_129 = arith.constant dense<0.000000e+00> : vector<32x128xf32>
    %168 = tpu.matmul %166, %167, %cst_129 {dimension_numbers = #tpu.dot_dimension_numbers<[1], [0], [0], [1], [0, 0, 1, 1], [], []>} : vector<32x64xbf16>, vector<64x128xbf16>, vector<32x128xf32> -> vector<32x128xf32>
    %c3 = arith.constant 3 : index
    %c0_130 = arith.constant 0 : index
    %169 = vector.load %arg5[%c3, %c0_130] : memref<4x128xf32, #tpu.memory_space<vmem>>, vector<1x128xf32>
    %c3_131 = arith.constant 3 : index
    %c0_132 = arith.constant 0 : index
    %170 = vector.load %arg6[%c3_131, %c0_132] : memref<4x128xf32, #tpu.memory_space<vmem>>, vector<1x128xf32>
    %cst_133 = arith.constant dense<0.000000e+00> : vector<128xf32>
    %171 = vector.multi_reduction <add>, %168, %cst_133 [0] : vector<32x128xf32> to vector<128xf32>
    %172 = vector.shape_cast %171 : vector<128xf32> to vector<1x128xf32>
    %173 = arith.mulf %168, %168 : vector<32x128xf32>
    %cst_134 = arith.constant dense<0.000000e+00> : vector<128xf32>
    %174 = vector.multi_reduction <add>, %173, %cst_134 [0] : vector<32x128xf32> to vector<128xf32>
    %175 = vector.shape_cast %174 : vector<128xf32> to vector<1x128xf32>
    %cst_135 = arith.constant dense<0.000000e+00> : vector<1x8xf32>
    %176 = tpu.matmul %172, %0, %cst_135 {dimension_numbers = #tpu.dot_dimension_numbers<[1], [0], [0], [1], [0, 0, 1, 1], [], []>} : vector<1x128xf32>, vector<128x8xf32>, vector<1x8xf32> -> vector<1x8xf32>
    %cst_136 = arith.constant dense<0.000000e+00> : vector<1x8xf32>
    %177 = tpu.matmul %175, %0, %cst_136 {dimension_numbers = #tpu.dot_dimension_numbers<[1], [0], [0], [1], [0, 0, 1, 1], [], []>} : vector<1x128xf32>, vector<128x8xf32>, vector<1x8xf32> -> vector<1x8xf32>
    %cst_137 = arith.constant 0.001953125 : f32
    %178 = vector.broadcast %cst_137 : f32 to vector<1x8xf32>
    %179 = arith.mulf %176, %178 : vector<1x8xf32>
    %cst_138 = arith.constant 0.001953125 : f32
    %180 = vector.broadcast %cst_138 : f32 to vector<1x8xf32>
    %181 = arith.mulf %177, %180 : vector<1x8xf32>
    %182 = arith.mulf %179, %179 : vector<1x8xf32>
    %183 = arith.subf %181, %182 : vector<1x8xf32>
    %cst_139 = arith.constant 0.000000e+00 : f32
    %184 = vector.broadcast %cst_139 : f32 to vector<1x8xf32>
    %185 = arith.maximumf %183, %184 : vector<1x8xf32>
    %cst_140 = arith.constant 9.99999974E-6 : f32
    %186 = vector.broadcast %cst_140 : f32 to vector<1x8xf32>
    %187 = arith.addf %185, %186 : vector<1x8xf32>
    %188 = math.rsqrt %187 : vector<1x8xf32>
    %cst_141 = arith.constant dense<0.000000e+00> : vector<1x128xf32>
    %189 = tpu.matmul %179, %1, %cst_141 {dimension_numbers = #tpu.dot_dimension_numbers<[1], [0], [0], [1], [0, 0, 1, 1], [], []>} : vector<1x8xf32>, vector<8x128xf32>, vector<1x128xf32> -> vector<1x128xf32>
    %cst_142 = arith.constant dense<0.000000e+00> : vector<1x128xf32>
    %190 = tpu.matmul %188, %1, %cst_142 {dimension_numbers = #tpu.dot_dimension_numbers<[1], [0], [0], [1], [0, 0, 1, 1], [], []>} : vector<1x8xf32>, vector<8x128xf32>, vector<1x128xf32> -> vector<1x128xf32>
    %191 = arith.mulf %169, %190 : vector<1x128xf32>
    %192 = arith.mulf %189, %191 : vector<1x128xf32>
    %193 = arith.subf %170, %192 : vector<1x128xf32>
    %194 = vector.broadcast %191 : vector<1x128xf32> to vector<32x128xf32>
    %195 = arith.mulf %168, %194 : vector<32x128xf32>
    %196 = vector.broadcast %193 : vector<1x128xf32> to vector<32x128xf32>
    %197 = arith.addf %195, %196 : vector<32x128xf32>
    %198 = arith.addf %164, %197 : vector<32x128xf32>
    %199 = vector.shape_cast %198 : vector<32x128xf32> to vector<2x16x128xf32>
    %c0_143 = arith.constant 0 : index
    %c0_144 = arith.constant 0 : index
    %c0_145 = arith.constant 0 : index
    %200 = vector.load %arg9[%c0_143, %c0_144, %c0_145] : memref<2x16x128xf32, #tpu.memory_space<vmem>>, vector<2x16x128xf32>
    tpu.vector_store %arg9[%c0_143, %c0_144, %c0_145], %199 {strides = array<i32>} : memref<2x16x128xf32, #tpu.memory_space<vmem>>, vector<2x16x128xf32>,
    return
  }
}

</mosaic_0001>

<bundles_post_ra>
// kernel: tpu_custom_call.1
= control target key start
LH: loop header
LB: loop body
LE: loop exit
PB: predicated region body
PF: predicated region fallthrough
CT: control target
= control target key end

     0   :  { %14 = vsyncpa [#allocation4], 0  ;;  %s5007_s0 = inlined_call_operand.vmem [shape: bf16[2,18,64], index: 0, kind: input, shape index: {}]   ;;  %s5008_s1 = inlined_call_operand.vmem [shape: bf16[3,64,128], index: 1, kind: input, shape index: {}]   ;;  %s5009_s2 = inlined_call_operand.hbm [shape: bf16[3,128,128], index: 2, kind: input, shape index: {}]   ;;  %s5010_s3 = inlined_call_operand.hbm [shape: bf16[3,128,128], index: 3, kind: input, shape index: {}]   ;;  %s5011_s4 = inlined_call_operand.vmem [shape: bf16[64,128], index: 4, kind: input, shape index: {}]   ;;  %s5012_s5 = inlined_call_operand.vmem [shape: f32[4,128], index: 5, kind: input, shape index: {}]   ;;  %s5013_s6 = inlined_call_operand.vmem [shape: f32[4,128], index: 6, kind: input, shape index: {}]   ;;  %s5014_s7 = inlined_call_operand.vmem [shape: f32[128,8], index: 7, kind: input, shape index: {}]   ;;  %s5015_s8 = inlined_call_operand.vmem [shape: f32[8,128], index: 8, kind: input, shape index: {}]   ;;  %s5016_s9 = inlined_call_operand.hbm [shape: f32[2,16,128], index: 9, kind: output, shape index: {}]  }
   0x1   :  { %15 = vsyncpa [#allocation7], 0 }
   0x2   :  { %16 = vsyncpa [#allocation5], 0  ;;  %s4069_s30 = smov [#allocation3]  }
   0x3   :  { %s26_s10 = sshll.u32 %s4069_s30, 4  ;;  %s27_s10 = int_to_ptr.vmem [resolvable:$true] %s26_s10 }
   0x4   :  { %s4011_s11 = scalar_lea.vmem %s27_s10, 3072  ;;  %p4016_p1 = scmp.lt.s32.totalorder %s27_s10, %s27_s10 }
   0x5   :  { %p4012_p0 = scmp.ne.s32.totalorder %s27_s10, %s4011_s11  ;;  %p4017_p2 = scmp.lt.s32.totalorder %s4011_s11, %s4011_s11 }
   0x7   :  { %p4018_p3 = por %p4017_p2, %p4016_p1 }
   0x9   :  { %p4019_p4 = pnand %p4018_p3, %p4012_p0 }
   0xb   :  { %4022 = shalt.err (!%p4019_p4)
}
   0xc   :  { %s4070_s12 = smov 64   ;;  %s4071_s13 = smov 4  }
   0xd   :  { %32 = dma.hbm_to_vmem [thread:$0]  %s5009_s2, 3072, %s27_s10, [#allocation4], %s4070_s12, %s4070_s12, %s4071_s13  }
   0xe   :  { %s4072_s16 = smov [#allocation6]  }
   0xf   :  { %s38_s17 = sshll.u32 %s4072_s16, 4  ;;  %s39_s17 = int_to_ptr.vmem [resolvable:$true] %s38_s17 }
  0x10   :  { %s4031_s18 = scalar_lea.vmem %s39_s17, 3072  ;;  %p4036_p6 = scmp.lt.s32.totalorder %s39_s17, %s39_s17 }
  0x11   :  { %p4032_p5 = scmp.ne.s32.totalorder %s39_s17, %s4031_s18  ;;  %p4037_p7 = scmp.lt.s32.totalorder %s4031_s18, %s4031_s18 }
  0x13   :  { %p4038_p8 = por %p4037_p7, %p4036_p6 }
  0x15   :  { %p4039_p9 = pnand %p4038_p8, %p4032_p5 }
  0x17   :  { %4042 = shalt.err (!%p4039_p9)
}
  0x18   :  { %44 = dma.hbm_to_vmem [thread:$0]  %s5010_s3, 3072, %s39_s17, [#allocation7], %s4070_s12, %s4070_s12, %s4071_s13  }
  0x19   :  { %4063 = dma.done.wait [#allocation4], 3072  }
  0x1a   :  { %4064 = vsyncadd [#allocation4], 4294964224 }
  0x1b   :  { %4065 = dma.done.wait [#allocation7], 3072  }
  0x1c   :  { %4066 = vsyncadd [#allocation7], 4294964224  ;;  %v3908_v0 = vld [vmem:[%s5008_s1 + $0x38] sm:$0xff]   ;;  %v3910_v2 = vld [vmem:[%s5008_s1 + $0x30] sm:$0xff]   ;;  %vm110_vm0 = vsmask.f32 3328 }
  0x1d   :  { %v3909_v1 = vld [vmem:[%s5008_s1 + $0x18] sm:$0xff]   ;;  %3411 = vmatprep.subr.bf16.mxu0 %v3908_v0  ;;  %v3911_v3 = vld [vmem:[%s5008_s1 + $0x10] sm:$0xff]   ;;  %vm111_vm1 = vsmask.f32 7440  ;;  %v3912_v4 = vld [vmem:[%s5008_s1 + $0x28] sm:$0xff]   ;;  %vm200_vm2 = vcmask 523264  }
  0x1e   :  { %3423 = vmatprep.subr.bf16.mxu1 %v3909_v1  ;;  %3412 = vmatpush3.bf16.msra.mxu0 %v3908_v0  ;;  %v3913_v5 = vld [vmem:[%s5008_s1 + $0x8] sm:$0xff]   ;;  %v3914_v6 = vld [vmem:[%s5008_s1 + $0x20] sm:$0xff]   ;;  %v4181_v18 = vld [vmem:[%s5007_s0 + $0x10] sm:$0xf]  ;;  %vm351_vm3 = vcmask 1042432   ;;  %vm352_vm5 = vcmask 1046532  }
  0x1f   :  { %3424 = vmatpush3.bf16.msra.mxu1 %v3909_v1  ;;  %3413 = vmatprep.subr.bf16.mxu0 %v3910_v2  ;;  %v3915_v7 = vld [vmem:[%s5008_s1] sm:$0xff]   ;;  %v4169_v10 = vld [vmem:[%s5007_s0 + $0x8] sm:$0x1]  ;;  %v98_v15 = vld [vmem:[%s5007_s0 + $0xc] sm:$0xf]  ;;  %v147_v27 = vshll.u32 %v4181_v18, 16 }
  0x20   :  { %3425 = vmatprep.subr.bf16.mxu1 %v3911_v3  ;;  %v96_v8 = vld [vmem:[%s5007_s0] sm:$0xf]  ;;  %v4164_v9 = vld [vmem:[%s5007_s0 + $0x4] sm:$0xf]  ;;  %v133_v16 = vshll.u32 %v4169_v10, 16  ;;  %v138_v25 = vshrl.u32 %v98_v15, 16  ;;  %vm4197_vm4 = vmor %vm110_vm0, %vm111_vm1  ;;  %v3054_v43 = vcombine.low %v98_v15, %v4181_v18 }
  0x21   :  { %v114_v11 = vshrl.u32 %v96_v8, 16  ;;  %v117_v12 = vshll.u32 %v96_v8, 16  ;;  %v123_v13 = vshll.u32 %v4164_v9, 16  ;;  %v127_v14 = vshrl.u32 %v4164_v9, 16  ;;  %v4186_v19 = vld [vmem:[%s5007_s0 + $0x14] sm:$0x1]  ;;  %vm4213_vm6 = vmor %vm351_vm3, %vm352_vm5 }
  0x22   :  { %3414 = vmatpush3.bf16.msra.mxu0 %v3910_v2  ;;  %v3053_v17 = vcombine.low %v96_v8, %v4164_v9  ;;  %v135_v24 = vrot.slane %v133_v16, 5  ;;  %v141_v26 = vshll.u32 %v98_v15, 16  ;;  %v151_v30 = vshrl.u32 %v4181_v18, 16  ;;  %v3918_v32 = vld [vmem:[%s5008_s1 + $0x58] sm:$0xff]   ;;  %v345_v48 = vld [vmem:[%s5007_s0] sm:$0xe] }
  0x23   :  { %3426 = vmatpush3.bf16.msra.mxu1 %v3911_v3  ;;  %3415 = vmatprep.subr.bf16.mxu0 %v3912_v4  ;;  %v116_v20 = vrot.slane %v114_v11, 4  ;;  %v119_v21 = vrot.slane %v117_v12, 5  ;;  %v125_v22 = vrot.slane %v123_v13, 5  ;;  %v129_v23 = vrot.slane %v127_v14, 4  ;;  %v346_v55 = vld [vmem:[%s5007_s0 + $0xc] sm:$0xe] }
  0x24   :  { %3427 = vmatprep.subr.bf16.mxu1 %v3913_v5  ;;  %3431 = vmatprep.mubr.msk.bf16.mxu1 %vm200_vm2, %v3053_v17  ;;  %v157_v31 = vshll.u32 %v4186_v19, 16  ;;  %v140_v34 = vrot.slane %v138_v25, 4  ;;  %v143_v35 = vrot.slane %v141_v26, 5  ;;  %v149_v36 = vrot.slane %v147_v27, 5  ;;  %v3919_v61 = vld [vmem:[%s5008_s1 + $0x50] sm:$0xff]   ;;  %v3920_v3 = vld [vmem:[%s5008_s1 + $0x48] sm:$0xff]  }
  0x25   :  { %v120_v28 = vor.u32 %v119_v21, %v116_v20  ;;  %v130_v29 = vor.u32 %v129_v23, %v125_v22  ;;  %v359_v39 = vrot.slane %v4169_v10, 5  ;;  %v153_v40 = vrot.slane %v151_v30, 4  ;;  %v4251_v8 = vld [vmem:[%s5014_s7 + $0x78] sm:$0xff]  ;;  %v4258_v10 = vld [vmem:[%s5014_s7 + $0x70] sm:$0xff]  ;;  %v4271_v11 = vld [vmem:[%s5014_s7 + $0x68] sm:$0xff] }
  0x26   :  { %3416 = vmatpush3.bf16.msra.mxu0 %v3912_v4  ;;  %v144_v41 = vor.u32 %v143_v35, %v140_v34  ;;  %v159_v42 = vrot.slane %v157_v31, 5  ;;  %v356_v44 = vrot.slane %v4164_v9, 5  ;;  %v363_v50 = vrot.slane %v4181_v18, 5  ;;  %v3921_v4 = vld [vmem:[%s5008_s1 + $0x40] sm:$0xff]   ;;  %v4288_v13 = vld [vmem:[%s5014_s7 + $0x58] sm:$0xff]  ;;  %v4297_v14 = vld [vmem:[%s5014_s7 + $0x50] sm:$0xff] }
  0x27   :  { %3428 = vmatpush3.bf16.msra.mxu1 %v3913_v5  ;;  %3417 = vmatprep.subr.bf16.mxu0 %v3914_v6  ;;  %v121_v37 = vrot.slane %v120_v28, 4  ;;  %v131_v38 = vrot.slane %v130_v29, 4  ;;  %v154_v47 = vor.u32 %v153_v40, %v149_v36  ;;  %v3061_v53 = vrot.slane %v345_v48, 9  ;;  %v4279_v12 = vld [vmem:[%s5014_s7 + $0x60] sm:$0xff]  ;;  %v4306_v15 = vld [vmem:[%s5014_s7 + $0x48] sm:$0xff]  ;;  %v4324_v17 = vld [vmem:[%s5014_s7 + $0x38] sm:$0xff] }
  0x28   :  { %3429 = vmatprep.subr.bf16.mxu1 %v3915_v7  ;;  %v145_v52 = vrot.slane %v144_v41, 4  ;;  %v358_v54 = vrot.slane %v356_v44, 4  ;;  %v366_v57 = vrot.slane %v4186_v19, 5  ;;  %v3062_v58 = vrot.slane %v346_v55, 9  ;;  %v4315_v16 = vld [vmem:[%s5014_s7 + $0x40] sm:$0xff]  ;;  %v4333_v18 = vld [vmem:[%s5014_s7 + $0x30] sm:$0xff] }
  0x29   :  { %v126_v45 = vsel %vm4197_vm4, %v121_v37, %v125_v22  ;;  %v136_v46 = vsel %vm4197_vm4, %v131_v38, %v135_v24  ;;  %v155_v56 = vrot.slane %v154_v47, 4  ;;  %v365_v59 = vrot.slane %v363_v50, 4  ;;  %v4342_v19 = vld [vmem:[%s5014_s7 + $0x28] sm:$0xff]  ;;  %v4351_v20 = vld [vmem:[%s5014_s7 + $0x20] sm:$0xff]  ;;  %v4357_v21 = vld [vmem:[%s5014_s7 + $0x18] sm:$0xff] }
  0x2a   :  { %3418 = vmatpush3.bf16.msra.mxu0 %v3914_v6  ;;  %v3045_v51 = vcombine.low %v126_v45, %v136_v46  ;;  %v150_v60 = vsel %vm4197_vm4, %v145_v52, %v149_v36  ;;  %v357_v62 = vsel %vm4213_vm6, %v3061_v53, %v356_v44  ;;  %v360_v63 = vsel %vm4213_vm6, %v358_v54, %v359_v39  ;;  %v4366_v22 = vld [vmem:[%s5014_s7 + $0x10] sm:$0xff]  ;;  %v4375_v23 = vld [vmem:[%s5014_s7 + $0x8] sm:$0xff]  ;;  %v4384_v24 = vld [vmem:[%s5014_s7] sm:$0xff] }
  0x2b   :  { %3430 = vmatpush3.bf16.msra.mxu1 %v3915_v7  ;;  %3435 = vmatprep.subr.bf16.mxu0 %v3918_v32  ;;  %v160_v0 = vsel %vm4197_vm4, %v155_v56, %v159_v42  ;;  %v3071_v1 = vcombine.low %v357_v62, %v360_v63  ;;  %v364_v5 = vsel %vm4213_vm6, %v3062_v58, %v363_v50  ;;  %v4073_v9 = vmov 0.0  }
  0x2c   :  { %3419 = vmatprep.mubr.msk.bf16.mxu0 %vm200_vm2, %v3045_v51  ;;  %v3046_v2 = vcombine.low %v150_v60, %v160_v0  ;;  %v367_v6 = vsel %vm4213_vm6, %v365_v59, %v366_v57  ;;  %3447 = vmatprep.subr.mxu1 %v4073_v9  ;;  %vm4074_vm7 = vmmov 0   ;;  %vm637_vm8 = vcmask 64512  }
  0x2d   :  { %v3072_v7 = vcombine.low %v364_v5, %v367_v6  ;;  %v4422_v5 = vld [vmem:[%s5015_s8] sm:$0xff]  ;;  %vm79_vm9 = vcmask 1040384   ;;  %vm80_vm10 = vsmask.f32 256  ;;  %vm88_vm12 = vsmask.f32 7938 }
  0x2e   :  { %3432 = vmatmul.mubr.msk.bf16.vlgmr.msra.gmra.mxu1 %vm200_vm2, %v3054_v43  ;;  %3420 = vmatmul.mubr.msk.bf16.vlgmr.msra.gmra.mxu0 %vm200_vm2, %v3046_v2  ;;  %vm4432_vm11 = vmand %vm79_vm9, %vm80_vm10  ;;  %vm827_vm3 = vsmask.f32 4368  ;;  %vm869_vm5 = vcmask 1043456  }
  0x2f   :  { %3436 = vmatpush3.bf16.msra.mxu0 %v3918_v32  ;;  %3443 = vmatprep.mubr.msk.bf16.mxu0 %vm200_vm2, %v3071_v1  ;;  %vm89_vm13 = vmand %vm79_vm9, %vm88_vm12 }
  0x30   :  { %3437 = vmatprep.subr.bf16.mxu0 %v3919_v61  ;;  %3448 = vmatpush3.msra.mxu1 %v4251_v8  ;;  %vm4460_vm9 = vmor %vm80_vm10, %vm827_vm3 }
  0x31   :  { %3449 = vmatprep.subr.mxu1 %v4073_v9  ;;  %3479 = vmatprep.mubr.msk.f32.mxu1 %vm4074_vm7, %v4073_v9 }
  0x32   :  { %3450 = vmatpush3.msra.mxu1 %v4258_v10 }
  0x33   :  { %3438 = vmatpush3.bf16.msra.mxu0 %v3919_v61  ;;  %3451 = vmatprep.subr.mxu1 %v4073_v9 }
  0x34   :  { %3439 = vmatprep.subr.bf16.mxu0 %v3920_v3  ;;  %3452 = vmatpush3.msra.mxu1 %v4271_v11 }
  0x35   :  { %3453 = vmatprep.subr.mxu1 %v4073_v9 }
  0x36   :  { %3454 = vmatpush3.msra.mxu1 %v4279_v12 }
  0x37   :  { %3440 = vmatpush3.bf16.msra.mxu0 %v3920_v3  ;;  %3455 = vmatprep.subr.mxu1 %v4073_v9 }
  0x38   :  { %3441 = vmatprep.subr.bf16.mxu0 %v3921_v4  ;;  %3456 = vmatpush3.msra.mxu1 %v4288_v13 }
  0x39   :  { %3457 = vmatprep.subr.mxu1 %v4073_v9 }
  0x3a   :  { %3458 = vmatpush3.msra.mxu1 %v4297_v14 }
  0x3b   :  { %3442 = vmatpush3.bf16.msra.mxu0 %v3921_v4  ;;  %3459 = vmatprep.subr.mxu1 %v4073_v9 }
  0x3c   :  { %3482 = vmatprep.subr.mxu0 %v4073_v9  ;;  %3460 = vmatpush3.msra.mxu1 %v4306_v15 }
  0x3d   :  { %3461 = vmatprep.subr.mxu1 %v4073_v9 }
  0x3e   :  { %3444 = vmatmul.mubr.msk.bf16.vlgmr.msra.gmra.mxu0 %vm200_vm2, %v3072_v7  ;;  %3462 = vmatpush3.msra.mxu1 %v4315_v16 }
  0x3f   :  { %3483 = vmatpush3.msra.mxu0 %v4251_v8  ;;  %3463 = vmatprep.subr.mxu1 %v4073_v9 }
  0x40   :  { %3484 = vmatprep.subr.mxu0 %v4073_v9  ;;  %3464 = vmatpush3.msra.mxu1 %v4324_v17 }
  0x41   :  { %3485 = vmatpush3.msra.mxu0 %v4258_v10  ;;  %3465 = vmatprep.subr.mxu1 %v4073_v9 }
  0x42   :  { %3486 = vmatprep.subr.mxu0 %v4073_v9  ;;  %3466 = vmatpush3.msra.mxu1 %v4333_v18 }
  0x43   :  { %3487 = vmatpush3.msra.mxu0 %v4271_v11  ;;  %3467 = vmatprep.subr.mxu1 %v4073_v9 }
  0x44   :  { %3488 = vmatprep.subr.mxu0 %v4073_v9  ;;  %3468 = vmatpush3.msra.mxu1 %v4342_v19 }
  0x45   :  { %3489 = vmatpush3.msra.mxu0 %v4279_v12  ;;  %3469 = vmatprep.subr.mxu1 %v4073_v9 }
  0x46   :  { %3490 = vmatprep.subr.mxu0 %v4073_v9  ;;  %3470 = vmatpush3.msra.mxu1 %v4351_v20 }
  0x47   :  { %3491 = vmatpush3.msra.mxu0 %v4288_v13  ;;  %3471 = vmatprep.subr.mxu1 %v4073_v9 }
  0x48   :  { %3492 = vmatprep.subr.mxu0 %v4073_v9  ;;  %3472 = vmatpush3.msra.mxu1 %v4357_v21 }
  0x49   :  { %3493 = vmatpush3.msra.mxu0 %v4297_v14  ;;  %3473 = vmatprep.subr.mxu1 %v4073_v9 }
  0x4a   :  { %3494 = vmatprep.subr.mxu0 %v4073_v9  ;;  %3474 = vmatpush3.msra.mxu1 %v4366_v22 }
  0x4b   :  { %3495 = vmatpush3.msra.mxu0 %v4306_v15  ;;  %3475 = vmatprep.subr.mxu1 %v4073_v9 }
  0x4c   :  { %3496 = vmatprep.subr.mxu0 %v4073_v9  ;;  %3476 = vmatpush3.msra.mxu1 %v4375_v23 }
  0x4d   :  { %3497 = vmatpush3.msra.mxu0 %v4315_v16  ;;  %3477 = vmatprep.subr.mxu1 %v4073_v9 }
  0x4e   :  { %3498 = vmatprep.subr.mxu0 %v4073_v9  ;;  %3478 = vmatpush3.msra.mxu1 %v4384_v24 }
  0x4f   :  { %3499 = vmatpush3.msra.mxu0 %v4324_v17  ;;  %3514 = vmatprep.mubr.msk.f32.mxu0 %vm4074_vm7, %v4073_v9 }
  0x50   :  { %3500 = vmatprep.subr.mxu0 %v4073_v9  ;;  %3517 = vmatprep.subr.mxu1 %v4073_v9 }
  0x51   :  { %3501 = vmatpush3.msra.mxu0 %v4333_v18 }
  0x52   :  { %3502 = vmatprep.subr.mxu0 %v4073_v9 }
  0x53   :  { %3503 = vmatpush3.msra.mxu0 %v4342_v19 }
  0x54   :  { %3504 = vmatprep.subr.mxu0 %v4073_v9 }
  0x55   :  { %3505 = vmatpush3.msra.mxu0 %v4351_v20 }
  0x56   :  { %3506 = vmatprep.subr.mxu0 %v4073_v9 }
  0x57   :  { %3507 = vmatpush3.msra.mxu0 %v4357_v21 }
  0x58   :  { %3508 = vmatprep.subr.mxu0 %v4073_v9 }
  0x59   :  { %3509 = vmatpush3.msra.mxu0 %v4366_v22 }
  0x5a   :  { %3510 = vmatprep.subr.mxu0 %v4073_v9 }
  0x5b   :  { %3511 = vmatpush3.msra.mxu0 %v4375_v23 }
  0x5c   :  { %3512 = vmatprep.subr.mxu0 %v4073_v9 }
  0x5d   :  { %3513 = vmatpush3.msra.mxu0 %v4384_v24 }
  0xee   :  { %v3421_v25 = vpop.f32.mrf.mxu0  ;;  %v3433_v26 = vpop.f32.mrf.mxu1 }
  0xef   :  { %v339_v38 = vadd.f32 %v3433_v26, %v3421_v25 }
  0xf0   :  { %v241_v27 = vpop.f32.mrf.mxu0  ;;  %v330_v28 = vpop.f32.mrf.mxu1 }
  0xf1   :  { %v331_v36 = vadd.f32 %v330_v28, %v241_v27 }
  0xf2   :  { %v3422_v29 = vpop.f32.mrf.mxu0  ;;  %v3434_v30 = vpop.f32.mrf.mxu1 }
  0xf3   :  { %v342_v42 = vadd.f32 %v3434_v30, %v3422_v29 }
  0xf4   :  { %v244_v31 = vpop.f32.mrf.mxu0  ;;  %v333_v34 = vpop.f32.mrf.mxu1 }
  0xf5   :  { %v334_v39 = vadd.f32 %v333_v34, %v244_v31 }
  0xfe   :  { %v3445_v32 = vpop.f32.mrf.mxu0 }
  0xff   :  { %v4399_v43 = vadd.f32 %v3445_v32, %v339_v38  ;;  %v90_v38 = vld [vmem:[#allocation2 + $0x8] sm:$0x1] }
 0x100   :  { %v447_v35 = vpop.f32.mrf.mxu0 }
 0x101   :  { %v4397_v40 = vadd.f32 %v447_v35, %v331_v36  ;;  %v479_v50 = vmul.f32 %v4399_v43, %v4399_v43  ;;  %v82_v35 = vld [vmem:[#allocation2] sm:$0x1] }
 0x102   :  { %v3446_v37 = vpop.f32.mrf.mxu0 }
 0x103   :  { %v477_v45 = vmul.f32 %v4397_v40, %v4397_v40  ;;  %v4405_v46 = vadd.f32 %v3446_v37, %v342_v42  ;;  %v85_v37 = vld [vmem:[#allocation2 + $0xc] sm:$0x1]  ;;  %v93_v42 = vld [vmem:[#allocation2 + $0x14] sm:$0x1] }
 0x104   :  { %v450_v41 = vpop.f32.mrf.mxu0 }
 0x105   :  { %v4401_v44 = vadd.f32 %v450_v41, %v334_v39  ;;  %v480_v53 = vmul.f32 %v4405_v46, %v4405_v46  ;;  %v83_v39 = vsel %vm4432_vm11, 0, %v82_v35  ;;  %v86_v41 = vsel %vm4432_vm11, 0, %v85_v37 }
 0x106   :  { %84 = vst [vmem:[#allocation2] sm:$0x1] %v83_v39  ;;  %87 = vst [vmem:[#allocation2 + $0xc] sm:$0x1] %v86_v41 }
 0x107   :  { %v468_v47 = vadd.f32 %v4401_v44, %v4397_v40  ;;  %v478_v48 = vmul.f32 %v4401_v44, %v4401_v44 }
 0x109   :  { %v469_v51 = vadd.f32 %v468_v47, %v4399_v43  ;;  %v481_v52 = vadd.f32 %v478_v48, %v477_v45  ;;  %v91_v45 = vsel %vm89_vm13, 0, %v90_v38  ;;  %v94_v47 = vsel %vm89_vm13, 0, %v93_v42  ;;  %v3922_v48 = vld [vmem:[#allocation3 + $0x38] sm:$0xff]   ;;  %vm4465_vm13 = vmand %vm869_vm5, %vm88_vm12 }
 0x10a   :  { %92 = vst [vmem:[#allocation2 + $0x8] sm:$0x1] %v91_v45  ;;  %95 = vst [vmem:[#allocation2 + $0x14] sm:$0x1] %v94_v47  ;;  %3547 = vmatprep.subr.bf16.mxu0 %v3922_v48 }
 0x10b   :  { %v470_v54 = vadd.f32 %v469_v51, %v4405_v46  ;;  %v482_v55 = vadd.f32 %v481_v52, %v479_v50  ;;  %v3923_v50 = vld [vmem:[#allocation3 + $0x30] sm:$0xff]   ;;  %v3924_v51 = vld [vmem:[#allocation3 + $0x78] sm:$0xff]   ;;  %v3925_v52 = vld [vmem:[#allocation3 + $0x28] sm:$0xff]  }
 0x10d   :  { %v471_v56 = vrot.slane %v470_v54, 4  ;;  %v483_v57 = vadd.f32 %v482_v55, %v480_v53  ;;  %v3926_v53 = vld [vmem:[#allocation3 + $0x70] sm:$0xff]   ;;  %v3928_v55 = vld [vmem:[#allocation3 + $0x68] sm:$0xff]  }
 0x10f   :  { %v472_v58 = vadd.f32 %v471_v56, %v470_v54  ;;  %v484_v59 = vrot.slane %v483_v57, 4  ;;  %v3927_v54 = vld [vmem:[#allocation3 + $0x20] sm:$0xff]   ;;  %v3929_v56 = vld [vmem:[#allocation3 + $0x18] sm:$0xff]  }
 0x111   :  { %v473_v60 = vrot.slane %v472_v58, 2  ;;  %v485_v61 = vadd.f32 %v484_v59, %v483_v57  ;;  %v3930_v57 = vld [vmem:[#allocation3 + $0x60] sm:$0xff]   ;;  %v3932_v59 = vld [vmem:[#allocation3 + $0x58] sm:$0xff]  }
 0x113   :  { %v474_v62 = vadd.f32 %v473_v60, %v472_v58  ;;  %v486_v63 = vrot.slane %v485_v61, 2  ;;  %v3931_v58 = vld [vmem:[#allocation3 + $0x10] sm:$0xff]   ;;  %v3933_v60 = vld [vmem:[#allocation3 + $0x8] sm:$0xff]  }
 0x115   :  { %v475_v0 = vrot.slane %v474_v62, 1  ;;  %v487_v1 = vadd.f32 %v486_v63, %v485_v61  ;;  %v3934_v61 = vld [vmem:[#allocation3 + $0x50] sm:$0xff]   ;;  %v3937_v63 = vld [vmem:[#allocation3 + $0x48] sm:$0xff]  }
 0x117   :  { %v476_v2 = vadd.f32 %v475_v0, %v474_v62  ;;  %v488_v3 = vrot.slane %v487_v1, 1  ;;  %v3935_v62 = vld [vmem:[#allocation3] sm:$0xff]  }
 0x118   :  { %v3939_v0 = vld [vmem:[#allocation3 + $0x40] sm:$0xff]  }
 0x119   :  { %3480 = vmatmul.mubr.f32.vlgmr.msra.gmra.mxu1 %v476_v2  ;;  %v489_v4 = vadd.f32 %v488_v3, %v487_v1  ;;  %v4442_v1 = vld [vmem:[#allocation3 + $0xb8] sm:$0xff]  }
 0x11a   :  { %3519 = vmatprep.mubr.msk.f32.mxu1 %vm4074_vm7, %v4073_v9  ;;  %3518 = vmatpush3.msra.mxu1 %v4422_v5 }
 0x11b   :  { %3515 = vmatmul.mubr.f32.vlgmr.msra.gmra.mxu0 %v489_v4  ;;  %3522 = vmatprep.subr.mxu1 %v4073_v9  ;;  %v787_v4 = vlaneseq }
 0x11c   :  { %3548 = vmatpush3.bf16.msra.mxu0 %v3922_v48 }
 0x11d   :  { %3549 = vmatprep.subr.bf16.mxu0 %v3923_v50 }
 0x120   :  { %3550 = vmatpush3.bf16.msra.mxu0 %v3923_v50 }
 0x121   :  { %3551 = vmatprep.subr.bf16.mxu0 %v3925_v52 }
 0x124   :  { %3552 = vmatpush3.bf16.msra.mxu0 %v3925_v52 }
 0x125   :  { %3553 = vmatprep.subr.bf16.mxu0 %v3927_v54 }
 0x128   :  { %3554 = vmatpush3.bf16.msra.mxu0 %v3927_v54 }
 0x129   :  { %3555 = vmatprep.subr.bf16.mxu0 %v3929_v56 }
 0x12c   :  { %3556 = vmatpush3.bf16.msra.mxu0 %v3929_v56 }
 0x12d   :  { %3557 = vmatprep.subr.bf16.mxu0 %v3931_v58 }
 0x130   :  { %3558 = vmatpush3.bf16.msra.mxu0 %v3931_v58 }
 0x131   :  { %3559 = vmatprep.subr.bf16.mxu0 %v3933_v60 }
 0x134   :  { %3560 = vmatpush3.bf16.msra.mxu0 %v3933_v60 }
 0x135   :  { %3561 = vmatprep.subr.bf16.mxu0 %v3935_v62 }
 0x138   :  { %3562 = vmatpush3.bf16.msra.mxu0 %v3935_v62 }
 0x139   :  { %3587 = vmatprep.subr.mxu0 %v4073_v9 }
 0x1d9   :  { %v556_v6 = vpop.f32.mrf.mxu1 }
 0x1da   :  { %v630_v7 = vmul.f32 0.001953125, %v556_v6  ;;  %v788_v6 = vshrl.u32 %v787_v4, 7 }
 0x1db   :  { %v3481_v25 = vpop.f32.mrf.mxu1  ;;  %v626_v26 = vpop.f32.mrf.mxu0 }
 0x1dc   :  { %v632_v27 = vmul.f32 %v630_v7, %v630_v7  ;;  %v631_v28 = vmul.f32 0.001953125, %v626_v26  ;;  %3520 = vmatmul.mubr.msk.f32.vlgmr.msra.gmra.mxu1 %vm637_vm8, %v630_v7  ;;  %v466_v7 = vld [vmem:[%s5012_s5] sm:$0x1]  ;;  %v4448_v25 = vsub.s32 0, %v788_v6 }
 0x1dd   :  { %v3516_v29 = vpop.f32.mrf.mxu0  ;;  %3523 = vmatpush3.msra.mxu1 %v4422_v5  ;;  %3524 = vmatprep.mubr.msk.f32.mxu1 %vm4074_vm7, %v4073_v9 }
 0x1de   :  { %v633_v30 = vsub.f32 %v631_v28, %v632_v27  ;;  %3527 = vmatprep.subr.bf16.mxu1 %v3924_v51  ;;  %v467_v28 = vld [vmem:[%s5013_s6] sm:$0x1] }
 0x1e0   :  { %v634_v31 = vmax.f32 %v633_v30, 0.0 }
 0x1e2   :  { %v635_v32 = vadd.f32 1e-05, %v634_v31 }
 0x1e4   :  { %3978 = vrsqrt.f32 %v635_v32 }
 0x1f1   :  { %v3979_v34 = vpop.eup %3978 }
 0x1f2   :  { %3525 = vmatmul.mubr.msk.f32.vlgmr.msra.gmra.mxu1 %vm637_vm8, %v3979_v34 }
 0x1f3   :  { %3528 = vmatpush3.bf16.msra.mxu1 %v3924_v51 }
 0x1f4   :  { %3529 = vmatprep.subr.bf16.mxu1 %v3926_v53 }
 0x1f7   :  { %3530 = vmatpush3.bf16.msra.mxu1 %v3926_v53 }
 0x1f8   :  { %3531 = vmatprep.subr.bf16.mxu1 %v3928_v55 }
 0x1fb   :  { %3532 = vmatpush3.bf16.msra.mxu1 %v3928_v55 }
 0x1fc   :  { %3533 = vmatprep.subr.bf16.mxu1 %v3930_v57 }
 0x1ff   :  { %3534 = vmatpush3.bf16.msra.mxu1 %v3930_v57 }
 0x200   :  { %3535 = vmatprep.subr.bf16.mxu1 %v3932_v59 }
 0x203   :  { %3536 = vmatpush3.bf16.msra.mxu1 %v3932_v59 }
 0x204   :  { %3537 = vmatprep.subr.bf16.mxu1 %v3934_v61 }
 0x207   :  { %3538 = vmatpush3.bf16.msra.mxu1 %v3934_v61 }
 0x208   :  { %3539 = vmatprep.subr.bf16.mxu1 %v3937_v63 }
 0x20b   :  { %3540 = vmatpush3.bf16.msra.mxu1 %v3937_v63 }
 0x20c   :  { %3541 = vmatprep.subr.bf16.mxu1 %v3939_v0 }
 0x20f   :  { %3542 = vmatpush3.bf16.msra.mxu1 %v3939_v0 }
 0x210   :  { %3567 = vmatprep.subr.bf16.mxu1 %v4442_v1 }
 0x29c   :  { %v707_v2 = vpop.f32.mrf.mxu1 }
 0x29e   :  { %v3521_v3 = vpop.f32.mrf.mxu1 }
 0x29f   :  { %v871_v3 = vld [vmem:[#allocation2] sm:$0xf] }
 0x2b2   :  { %v780_v26 = vpop.f32.mrf.mxu1 }
 0x2b3   :  { %v784_v27 = vmul.f32 %v780_v26, %v466_v7 }
 0x2b4   :  { %v3526_v29 = vpop.f32.mrf.mxu1 }
 0x2b5   :  { %v785_v30 = vmul.f32 %v784_v27, %v707_v2  ;;  %v790_v31 = vrot.slane %v784_v27, %v4448_v25 }
 0x2b7   :  { %v786_v32 = vsub.f32 %v467_v28, %v785_v30  ;;  %v791_v34 = vmul.f32 %v790_v31, %v4397_v40  ;;  %v792_v35 = vmul.f32 %v790_v31, %v4401_v44  ;;  %v793_v37 = vmul.f32 %v790_v31, %v4399_v43  ;;  %v875_v28 = vld [vmem:[#allocation2 + $0x8] sm:$0x1] }
 0x2b8   :  { %v794_v38 = vmul.f32 %v790_v31, %v4405_v46 }
 0x2b9   :  { %v798_v39 = vrot.slane %v786_v32, %v4448_v25 }
 0x2bb   :  { %v799_v41 = vadd.f32 %v798_v39, %v791_v34  ;;  %v800_v42 = vadd.f32 %v798_v39, %v792_v35  ;;  %v801_v45 = vadd.f32 %v798_v39, %v793_v37  ;;  %v802_v47 = vadd.f32 %v798_v39, %v794_v38  ;;  %v878_v34 = vld [vmem:[#allocation2 + $0xc] sm:$0xf]  ;;  %v882_v35 = vld [vmem:[#allocation2 + $0x14] sm:$0x1] }
 0x2bd   :  { %vm803_vm14 = vcmp.gt.f32.partialorder %v799_v41, 0.0  ;;  %vm804_vm15 = vcmp.gt.f32.partialorder %v800_v42, 0.0  ;;  %vm805_vm0 = vcmp.gt.f32.partialorder %v801_v45, 0.0  ;;  %vm806_vm1 = vcmp.gt.f32.partialorder %v802_v47, 0.0 }
 0x2be   :  { %v807_v48 = vmul.f32 0.1, %v799_v41  ;;  %v808_v50 = vmul.f32 0.1, %v800_v42  ;;  %v809_v51 = vmul.f32 0.1, %v801_v45 }
 0x2bf   :  { %v810_v40 = vmul.f32 0.1, %v802_v47 }
 0x2c0   :  { %v811_v52 = vsel %vm803_vm14, %v799_v41, %v807_v48  ;;  %v812_v44 = vsel %vm804_vm15, %v800_v42, %v808_v50  ;;  %v813_v53 = vsel %vm805_vm0, %v801_v45, %v809_v51 }
 0x2c1   :  { %v814_v43 = vsel %vm806_vm1, %v802_v47, %v810_v40  ;;  %v3167_v54 = vpack.c.bf16 %v811_v52, %v811_v52  ;;  %v3168_v46 = vpack.c.bf16 %v812_v44, %v812_v44  ;;  %v3169_v55 = vpack.c.bf16 %v813_v53, %v813_v53 }
 0x2c2   :  { %v3170_v56 = vpack.c.bf16 %v814_v43, %v814_v43 }
 0x2c3   :  { %v830_v57 = vshrl.u32 %v3167_v54, 16  ;;  %v838_v58 = vshrl.u32 %v3168_v46, 16  ;;  %v847_v59 = vshrl.u32 %v3169_v55, 16  ;;  %v833_v63 = vshll.u32 %v3167_v54, 16 }
 0x2c4   :  { %v855_v60 = vshrl.u32 %v3170_v56, 16  ;;  %v841_v2 = vshll.u32 %v3168_v46, 16  ;;  %v850_v6 = vshll.u32 %v3169_v55, 16  ;;  %v858_v26 = vshll.u32 %v3170_v56, 16 }
 0x2c5   :  { %v832_v62 = vrot.slane %v830_v57, 7  ;;  %v840_v0 = vrot.slane %v838_v58, 7  ;;  %v849_v4 = vrot.slane %v847_v59, 7 }
 0x2c6   :  { %v857_v7 = vrot.slane %v855_v60, 7 }
 0x2c7   :  { %v835_v29 = vor.u32 %v833_v63, %v832_v62  ;;  %v836_v30 = vrot.slane %v832_v62, 4  ;;  %v843_v31 = vor.u32 %v841_v2, %v840_v0  ;;  %v845_v32 = vrot.slane %v840_v0, 4 }
 0x2c8   :  { %v852_v37 = vor.u32 %v850_v6, %v849_v4  ;;  %v853_v38 = vrot.slane %v849_v4, 4  ;;  %v860_v39 = vor.u32 %v858_v26, %v857_v7  ;;  %v862_v41 = vrot.slane %v857_v7, 4 }
 0x2c9   :  { %v844_v42 = vsel %vm4460_vm9, %v836_v30, %v843_v31  ;;  %v872_v45 = vsel %vm4465_vm13, %v835_v29, %v871_v3  ;;  %v876_v47 = vsel %vm4432_vm11, %v845_v32, %v875_v28 }
 0x2ca   :  { %v861_v48 = vsel %vm4460_vm9, %v853_v38, %v860_v39  ;;  %873 = vst [vmem:[#allocation2] sm:$0xf] %v872_v45  ;;  %874 = vst [vmem:[#allocation2 + $0x4] sm:$0xf] %v844_v42  ;;  %v879_v50 = vsel %vm4465_vm13, %v852_v37, %v878_v34  ;;  %v883_v51 = vsel %vm4432_vm11, %v862_v41, %v882_v35 }
 0x2cb   :  { %877 = vst [vmem:[#allocation2 + $0x8] sm:$0x1] %v876_v47  ;;  %880 = vst [vmem:[#allocation2 + $0xc] sm:$0xf] %v879_v50 }
 0x2cc   :  { %881 = vst [vmem:[#allocation2 + $0x10] sm:$0xf] %v861_v48  ;;  %884 = vst [vmem:[#allocation2 + $0x14] sm:$0x1] %v883_v51 }
 0x2d1   :  { %v4481_v40 = vld [vmem:[#allocation2] sm:$0xf]  ;;  %v886_v52 = vld [vmem:[#allocation2 + $0x4] sm:$0xf] }
 0x2d2   :  { %v3095_v44 = vcombine.low %v4481_v40, %v886_v52  ;;  %v887_v53 = vld [vmem:[#allocation2 + $0xc] sm:$0xf]  ;;  %v908_v54 = vshrl.u32 %v4481_v40, 16  ;;  %v911_v46 = vshll.u32 %v4481_v40, 16  ;;  %v905_v58 = vld [vmem:[#allocation2 + $0x8] sm:$0x1] }
 0x2d3   :  { %v4484_v43 = vld [vmem:[#allocation2 + $0x10] sm:$0xf]  ;;  %v932_v55 = vshrl.u32 %v887_v53, 16  ;;  %v935_v56 = vshll.u32 %v887_v53, 16  ;;  %v917_v59 = vshll.u32 %v886_v52, 16  ;;  %v921_v63 = vshrl.u32 %v886_v52, 16 }
 0x2d4   :  { %v3096_v57 = vcombine.low %v887_v53, %v4484_v43  ;;  %3563 = vmatprep.mubr.bf16.mxu0 %v3095_v44  ;;  %v910_v60 = vrot.slane %v908_v54, 4  ;;  %v913_v62 = vrot.slane %v911_v46, 5  ;;  %v4489_v0 = vld [vmem:[#allocation2 + $0x14] sm:$0x1]  ;;  %v941_v6 = vshll.u32 %v4484_v43, 16 }
 0x2d5   :  { %v919_v2 = vrot.slane %v917_v59, 5  ;;  %v934_v3 = vrot.slane %v932_v55, 4  ;;  %v937_v4 = vrot.slane %v935_v56, 5  ;;  %v923_v26 = vrot.slane %v921_v63, 4  ;;  %v1186_v38 = vld [vmem:[#allocation2] sm:$0xe] }
 0x2d6   :  { %3564 = vmatmul.mubr.bf16.vlgmr.msra.gmra.mxu0 %v3096_v57  ;;  %v914_v7 = vor.u32 %v913_v62, %v910_v60  ;;  %v927_v28 = vshll.u32 %v905_v58, 16  ;;  %v945_v29 = vshrl.u32 %v4484_v43, 16  ;;  %v943_v31 = vrot.slane %v941_v6, 5  ;;  %v3941_v60 = vld [vmem:[#allocation3 + $0xb0] sm:$0xff]   ;;  %v3942_v63 = vld [vmem:[#allocation3 + $0xa8] sm:$0xff]  }
 0x2d7   :  { %3588 = vmatpush3.msra.mxu0 %v4251_v8  ;;  %3619 = vmatprep.mubr.msk.f32.mxu0 %vm4074_vm7, %v4073_v9  ;;  %v938_v30 = vor.u32 %v937_v4, %v934_v3  ;;  %v951_v32 = vshll.u32 %v4489_v0, 16  ;;  %v924_v35 = vor.u32 %v923_v26, %v919_v2  ;;  %v1194_v39 = vrot.slane %v886_v52, 5  ;;  %v3945_v3 = vld [vmem:[#allocation3 + $0x90] sm:$0xff]   ;;  %v3946_v4 = vld [vmem:[#allocation3 + $0x88] sm:$0xff]  }
 0x2d8   :  { %3589 = vmatprep.subr.mxu0 %v4073_v9  ;;  %v915_v34 = vrot.slane %v914_v7, 4  ;;  %v947_v37 = vrot.slane %v945_v29, 4  ;;  %v929_v47 = vrot.slane %v927_v28, 5  ;;  %v3105_v50 = vrot.slane %v1186_v38, 9  ;;  %v3947_v7 = vld [vmem:[#allocation3 + $0x80] sm:$0xff]  }
 0x2d9   :  { %3590 = vmatpush3.msra.mxu0 %v4258_v10  ;;  %v939_v41 = vrot.slane %v938_v30, 4  ;;  %v925_v45 = vrot.slane %v924_v35, 4  ;;  %v1196_v51 = vrot.slane %v1194_v39, 4  ;;  %v1197_v44 = vrot.slane %v905_v58, 5  ;;  %v1187_v26 = vld [vmem:[#allocation2 + $0xc] sm:$0xe] }
 0x2da   :  { %3591 = vmatprep.subr.mxu0 %v4073_v9  ;;  %v920_v42 = vsel %vm4197_vm4, %v915_v34, %v919_v2  ;;  %v948_v48 = vor.u32 %v947_v37, %v943_v31  ;;  %v953_v46 = vrot.slane %v951_v32, 5  ;;  %v1195_v59 = vsel %vm4213_vm6, %v3105_v50, %v1194_v39  ;;  %v3943_v2 = vld [vmem:[#allocation3 + $0xa0] sm:$0xff]  }
 0x2db   :  { %3592 = vmatpush3.msra.mxu0 %v4271_v11  ;;  %v930_v52 = vsel %vm4197_vm4, %v925_v45, %v929_v47  ;;  %v944_v53 = vsel %vm4197_vm4, %v939_v41, %v943_v31  ;;  %v1198_v56 = vsel %vm4213_vm6, %v1196_v51, %v1197_v44  ;;  %v1201_v6 = vrot.slane %v4484_v43, 5 }
 0x2dc   :  { %3593 = vmatprep.subr.mxu0 %v4073_v9  ;;  %v949_v54 = vrot.slane %v948_v48, 4  ;;  %v3085_v55 = vcombine.low %v920_v42, %v930_v52  ;;  %v3107_v62 = vcombine.low %v1195_v59, %v1198_v56  ;;  %v3106_v29 = vrot.slane %v1187_v26, 9 }
 0x2dd   :  { %3594 = vmatpush3.msra.mxu0 %v4279_v12  ;;  %v1203_v28 = vrot.slane %v1201_v6, 4  ;;  %v1204_v30 = vrot.slane %v4489_v0, 5 }
 0x2de   :  { %3595 = vmatprep.subr.mxu0 %v4073_v9  ;;  %v954_v57 = vsel %vm4197_vm4, %v949_v54, %v953_v46  ;;  %3543 = vmatprep.mubr.bf16.mxu1 %v3085_v55  ;;  %v1202_v43 = vsel %vm4213_vm6, %v3106_v29, %v1201_v6 }
 0x2df   :  { %3596 = vmatpush3.msra.mxu0 %v4288_v13  ;;  %v3086_v58 = vcombine.low %v944_v53, %v954_v57  ;;  %v1205_v31 = vsel %vm4213_vm6, %v1203_v28, %v1204_v30 }
 0x2e0   :  { %3597 = vmatprep.subr.mxu0 %v4073_v9  ;;  %v3108_v32 = vcombine.low %v1202_v43, %v1205_v31  ;;  %v3948_v43 = vld [vmem:[#allocation6 + $0x38] sm:$0xff]  }
 0x2e1   :  { %3598 = vmatpush3.msra.mxu0 %v4297_v14  ;;  %3544 = vmatmul.mubr.bf16.vlgmr.msra.gmra.mxu1 %v3086_v58 }
 0x2e2   :  { %3599 = vmatprep.subr.mxu0 %v4073_v9  ;;  %3568 = vmatpush3.bf16.msra.mxu1 %v4442_v1  ;;  %v3944_v1 = vld [vmem:[#allocation3 + $0x98] sm:$0xff]  }
 0x2e3   :  { %3583 = vmatprep.mubr.bf16.mxu1 %v3107_v62  ;;  %3569 = vmatprep.subr.bf16.mxu1 %v3941_v60 }
 0x2e4   :  { %3600 = vmatpush3.msra.mxu0 %v4306_v15 }
 0x2e5   :  { %3601 = vmatprep.subr.mxu0 %v4073_v9 }
 0x2e6   :  { %3602 = vmatpush3.msra.mxu0 %v4315_v16  ;;  %3570 = vmatpush3.bf16.msra.mxu1 %v3941_v60 }
 0x2e7   :  { %3603 = vmatprep.subr.mxu0 %v4073_v9  ;;  %3571 = vmatprep.subr.bf16.mxu1 %v3942_v63 }
 0x2e8   :  { %3604 = vmatpush3.msra.mxu0 %v4324_v17 }
 0x2e9   :  { %3605 = vmatprep.subr.mxu0 %v4073_v9 }
 0x2ea   :  { %3606 = vmatpush3.msra.mxu0 %v4333_v18  ;;  %3572 = vmatpush3.bf16.msra.mxu1 %v3942_v63 }
 0x2eb   :  { %3607 = vmatprep.subr.mxu0 %v4073_v9  ;;  %3573 = vmatprep.subr.bf16.mxu1 %v3943_v2 }
 0x2ec   :  { %3608 = vmatpush3.msra.mxu0 %v4342_v19 }
 0x2ed   :  { %3609 = vmatprep.subr.mxu0 %v4073_v9 }
 0x2ee   :  { %3610 = vmatpush3.msra.mxu0 %v4351_v20  ;;  %3574 = vmatpush3.bf16.msra.mxu1 %v3943_v2 }
 0x2ef   :  { %3611 = vmatprep.subr.mxu0 %v4073_v9  ;;  %3575 = vmatprep.subr.bf16.mxu1 %v3944_v1 }
 0x2f0   :  { %3612 = vmatpush3.msra.mxu0 %v4357_v21 }
 0x2f1   :  { %3613 = vmatprep.subr.mxu0 %v4073_v9 }
 0x2f2   :  { %3614 = vmatpush3.msra.mxu0 %v4366_v22  ;;  %3576 = vmatpush3.bf16.msra.mxu1 %v3944_v1 }
 0x2f3   :  { %3615 = vmatprep.subr.mxu0 %v4073_v9  ;;  %3577 = vmatprep.subr.bf16.mxu1 %v3945_v3 }
 0x2f4   :  { %3616 = vmatpush3.msra.mxu0 %v4375_v23 }
 0x2f5   :  { %3617 = vmatprep.subr.mxu0 %v4073_v9 }
 0x2f6   :  { %3618 = vmatpush3.msra.mxu0 %v4384_v24  ;;  %3578 = vmatpush3.bf16.msra.mxu1 %v3945_v3 }
 0x2f7   :  { %3657 = vmatprep.subr.mxu0 %v4073_v9  ;;  %3579 = vmatprep.subr.bf16.mxu1 %v3946_v4 }
 0x2fa   :  { %3580 = vmatpush3.bf16.msra.mxu1 %v3946_v4 }
 0x2fb   :  { %3581 = vmatprep.subr.bf16.mxu1 %v3947_v7 }
 0x2fe   :  { %3582 = vmatpush3.bf16.msra.mxu1 %v3947_v7 }
 0x2ff   :  { %3622 = vmatprep.subr.mxu1 %v4073_v9 }
 0x301   :  { %3584 = vmatmul.mubr.bf16.vlgmr.msra.gmra.mxu1 %v3108_v32  ;;  %v3949_v32 = vld [vmem:[#allocation6 + $0x30] sm:$0xff]  }
 0x302   :  { %3623 = vmatpush3.msra.mxu1 %v4251_v8  ;;  %3654 = vmatprep.mubr.msk.f32.mxu1 %vm4074_vm7, %v4073_v9 }
 0x303   :  { %3624 = vmatprep.subr.mxu1 %v4073_v9 }
 0x304   :  { %3625 = vmatpush3.msra.mxu1 %v4258_v10 }
 0x305   :  { %3626 = vmatprep.subr.mxu1 %v4073_v9 }
 0x306   :  { %3627 = vmatpush3.msra.mxu1 %v4271_v11 }
 0x307   :  { %3628 = vmatprep.subr.mxu1 %v4073_v9 }
 0x308   :  { %3629 = vmatpush3.msra.mxu1 %v4279_v12 }
 0x309   :  { %3630 = vmatprep.subr.mxu1 %v4073_v9 }
 0x30a   :  { %3631 = vmatpush3.msra.mxu1 %v4288_v13 }
 0x30b   :  { %3632 = vmatprep.subr.mxu1 %v4073_v9 }
 0x30c   :  { %3633 = vmatpush3.msra.mxu1 %v4297_v14 }
 0x30d   :  { %3634 = vmatprep.subr.mxu1 %v4073_v9 }
 0x30e   :  { %3635 = vmatpush3.msra.mxu1 %v4306_v15 }
 0x30f   :  { %3636 = vmatprep.subr.mxu1 %v4073_v9 }
 0x310   :  { %3637 = vmatpush3.msra.mxu1 %v4315_v16 }
 0x311   :  { %3638 = vmatprep.subr.mxu1 %v4073_v9 }
 0x312   :  { %3639 = vmatpush3.msra.mxu1 %v4324_v17 }
 0x313   :  { %3640 = vmatprep.subr.mxu1 %v4073_v9 }
 0x314   :  { %3641 = vmatpush3.msra.mxu1 %v4333_v18 }
 0x315   :  { %3642 = vmatprep.subr.mxu1 %v4073_v9 }
 0x316   :  { %3643 = vmatpush3.msra.mxu1 %v4342_v19 }
 0x317   :  { %3644 = vmatprep.subr.mxu1 %v4073_v9 }
 0x318   :  { %3645 = vmatpush3.msra.mxu1 %v4351_v20 }
 0x319   :  { %3646 = vmatprep.subr.mxu1 %v4073_v9 }
 0x31a   :  { %3647 = vmatpush3.msra.mxu1 %v4357_v21 }
 0x31b   :  { %3648 = vmatprep.subr.mxu1 %v4073_v9 }
 0x31c   :  { %3649 = vmatpush3.msra.mxu1 %v4366_v22 }
 0x31d   :  { %3650 = vmatprep.subr.mxu1 %v4073_v9 }
 0x31e   :  { %3651 = vmatpush3.msra.mxu1 %v4375_v23 }
 0x31f   :  { %3652 = vmatprep.subr.mxu1 %v4073_v9 }
 0x320   :  { %3653 = vmatpush3.msra.mxu1 %v4384_v24 }
 0x321   :  { %3687 = vmatprep.subr.bf16.mxu1 %v3948_v43 }
 0x396   :  { %v3565_v11 = vpop.f32.mrf.mxu0 }
 0x398   :  { %v1171_v13 = vpop.f32.mrf.mxu0 }
 0x39a   :  { %v3566_v15 = vpop.f32.mrf.mxu0 }
 0x39c   :  { %v1174_v19 = vpop.f32.mrf.mxu0 }
 0x3a1   :  { %v3545_v8 = vpop.f32.mrf.mxu1 }
 0x3a2   :  { %v1180_v21 = vadd.f32 %v3565_v11, %v3545_v8  ;;  %v3950_v8 = vld [vmem:[#allocation6 + $0x78] sm:$0xff]   ;;  %v3953_v11 = vld [vmem:[#allocation6 + $0x20] sm:$0xff]  }
 0x3a3   :  { %v1062_v10 = vpop.f32.mrf.mxu1 }
 0x3a4   :  { %v1172_v18 = vadd.f32 %v1171_v13, %v1062_v10  ;;  %v3951_v10 = vld [vmem:[#allocation6 + $0x28] sm:$0xff]   ;;  %v3955_v13 = vld [vmem:[#allocation6 + $0x18] sm:$0xff]  }
 0x3a5   :  { %v3546_v12 = vpop.f32.mrf.mxu1 }
 0x3a6   :  { %v1183_v34 = vadd.f32 %v3566_v15, %v3546_v12  ;;  %v3954_v12 = vld [vmem:[#allocation6 + $0x68] sm:$0xff]   ;;  %v3957_v15 = vld [vmem:[#allocation6 + $0x10] sm:$0xff]  }
 0x3a7   :  { %v1065_v14 = vpop.f32.mrf.mxu1 }
 0x3a8   :  { %v1175_v22 = vadd.f32 %v1174_v19, %v1065_v14  ;;  %v3956_v14 = vld [vmem:[#allocation6 + $0x60] sm:$0xff]  }
 0x3a9   :  { %v3961_v19 = vld [vmem:[#allocation6] sm:$0xff]  }
 0x3c1   :  { %v3585_v16 = vpop.f32.mrf.mxu1 }
 0x3c2   :  { %v4583_v35 = vadd.f32 %v3585_v16, %v1180_v21  ;;  %v3958_v16 = vld [vmem:[#allocation6 + $0x58] sm:$0xff]   ;;  %v3965_v21 = vld [vmem:[#allocation6 + $0x40] sm:$0xff]  }
 0x3c3   :  { %v1313_v17 = vpop.f32.mrf.mxu1 }
 0x3c4   :  { %v4581_v0 = vadd.f32 %v1313_v17, %v1172_v18  ;;  %v1345_v42 = vmul.f32 %v4583_v35, %v4583_v35  ;;  %v3959_v17 = vld [vmem:[#allocation6 + $0x8] sm:$0xff]   ;;  %v3960_v18 = vld [vmem:[#allocation6 + $0x50] sm:$0xff]  }
 0x3c5   :  { %v3586_v20 = vpop.f32.mrf.mxu1 }
 0x3c6   :  { %v1343_v37 = vmul.f32 %v4581_v0, %v4581_v0  ;;  %v4589_v38 = vadd.f32 %v3586_v20, %v1183_v34  ;;  %v3963_v20 = vld [vmem:[#allocation6 + $0x48] sm:$0xff]  }
 0x3c7   :  { %v1316_v23 = vpop.f32.mrf.mxu1 }
 0x3c8   :  { %v4585_v24 = vadd.f32 %v1316_v23, %v1175_v22  ;;  %v1346_v48 = vmul.f32 %v4589_v38, %v4589_v38  ;;  %v4611_v22 = vld [vmem:[#allocation6 + $0xb8] sm:$0xff]  }
 0x3ca   :  { %v1334_v39 = vadd.f32 %v4585_v24, %v4581_v0  ;;  %v1344_v41 = vmul.f32 %v4585_v24, %v4585_v24 }
 0x3cc   :  { %v1335_v45 = vadd.f32 %v1334_v39, %v4583_v35  ;;  %v1347_v47 = vadd.f32 %v1344_v41, %v1343_v37  ;;  %v1332_v37 = vld [vmem:[%s5012_s5 + $0x1] sm:$0x1] }
 0x3ce   :  { %v1336_v50 = vadd.f32 %v1335_v45, %v4589_v38  ;;  %v1348_v51 = vadd.f32 %v1347_v47, %v1345_v42  ;;  %v1333_v42 = vld [vmem:[%s5013_s6 + $0x1] sm:$0x1] }
 0x3d0   :  { %v1337_v44 = vrot.slane %v1336_v50, 4  ;;  %v1349_v52 = vadd.f32 %v1348_v51, %v1346_v48 }
 0x3d2   :  { %v1338_v53 = vadd.f32 %v1337_v44, %v1336_v50  ;;  %v1350_v54 = vrot.slane %v1349_v52, 4 }
 0x3d4   :  { %v1339_v46 = vrot.slane %v1338_v53, 2  ;;  %v1351_v55 = vadd.f32 %v1350_v54, %v1349_v52 }
 0x3d6   :  { %v1340_v56 = vadd.f32 %v1339_v46, %v1338_v53  ;;  %v1352_v57 = vrot.slane %v1351_v55, 2 }
 0x3d8   :  { %v1341_v58 = vrot.slane %v1340_v56, 1  ;;  %v1353_v59 = vadd.f32 %v1352_v57, %v1351_v55 }
 0x3da   :  { %v1342_v60 = vadd.f32 %v1341_v58, %v1340_v56  ;;  %v1354_v62 = vrot.slane %v1353_v59, 1 }
 0x3dc   :  { %3620 = vmatmul.mubr.f32.vlgmr.msra.gmra.mxu0 %v1342_v60  ;;  %v1355_v63 = vadd.f32 %v1354_v62, %v1353_v59 }
 0x3dd   :  { %3658 = vmatpush3.msra.mxu0 %v4422_v5  ;;  %3659 = vmatprep.mubr.msk.f32.mxu0 %vm4074_vm7, %v4073_v9 }
 0x3de   :  { %3655 = vmatmul.mubr.f32.vlgmr.msra.gmra.mxu1 %v1355_v63  ;;  %3662 = vmatprep.subr.mxu0 %v4073_v9 }
 0x3df   :  { %3688 = vmatpush3.bf16.msra.mxu1 %v3948_v43 }
 0x3e0   :  { %3689 = vmatprep.subr.bf16.mxu1 %v3949_v32 }
 0x3e3   :  { %3690 = vmatpush3.bf16.msra.mxu1 %v3949_v32 }
 0x3e4   :  { %3691 = vmatprep.subr.bf16.mxu1 %v3951_v10 }
 0x3e7   :  { %3692 = vmatpush3.bf16.msra.mxu1 %v3951_v10 }
 0x3e8   :  { %3693 = vmatprep.subr.bf16.mxu1 %v3953_v11 }
 0x3eb   :  { %3694 = vmatpush3.bf16.msra.mxu1 %v3953_v11 }
 0x3ec   :  { %3695 = vmatprep.subr.bf16.mxu1 %v3955_v13 }
 0x3ef   :  { %3696 = vmatpush3.bf16.msra.mxu1 %v3955_v13 }
 0x3f0   :  { %3697 = vmatprep.subr.bf16.mxu1 %v3957_v15 }
 0x3f3   :  { %3698 = vmatpush3.bf16.msra.mxu1 %v3957_v15 }
 0x3f4   :  { %3699 = vmatprep.subr.bf16.mxu1 %v3959_v17 }
 0x3f7   :  { %3700 = vmatpush3.bf16.msra.mxu1 %v3959_v17 }
 0x3f8   :  { %3701 = vmatprep.subr.bf16.mxu1 %v3961_v19 }
 0x3fb   :  { %3702 = vmatpush3.bf16.msra.mxu1 %v3961_v19 }
 0x3fc   :  { %3727 = vmatprep.subr.mxu1 %v4073_v9 }
 0x49c   :  { %v1422_v2 = vpop.f32.mrf.mxu0 }
 0x49d   :  { %v1496_v1 = vmul.f32 0.001953125, %v1422_v2 }
 0x49e   :  { %v3621_v3 = vpop.f32.mrf.mxu0  ;;  %v1492_v4 = vpop.f32.mrf.mxu1 }
 0x49f   :  { %v1498_v6 = vmul.f32 %v1496_v1, %v1496_v1  ;;  %v1497_v7 = vmul.f32 0.001953125, %v1492_v4  ;;  %3660 = vmatmul.mubr.msk.f32.vlgmr.msra.gmra.mxu0 %vm637_vm8, %v1496_v1 }
 0x4a0   :  { %v3656_v26 = vpop.f32.mrf.mxu1  ;;  %3663 = vmatpush3.msra.mxu0 %v4422_v5  ;;  %3664 = vmatprep.mubr.msk.f32.mxu0 %vm4074_vm7, %v4073_v9  ;;  %v3952_v5 = vld [vmem:[#allocation6 + $0x70] sm:$0xff]  }
 0x4a1   :  { %v1499_v28 = vsub.f32 %v1497_v7, %v1498_v6  ;;  %3667 = vmatprep.subr.bf16.mxu0 %v3950_v8 }
 0x4a3   :  { %v1500_v29 = vmax.f32 %v1499_v28, 0.0 }
 0x4a5   :  { %v1501_v30 = vadd.f32 1e-05, %v1500_v29 }
 0x4a7   :  { %3980 = vrsqrt.f32 %v1501_v30 }
 0x4b4   :  { %v3981_v31 = vpop.eup %3980 }
 0x4b5   :  { %3665 = vmatmul.mubr.msk.f32.vlgmr.msra.gmra.mxu0 %vm637_vm8, %v3981_v31 }
 0x4b6   :  { %3668 = vmatpush3.bf16.msra.mxu0 %v3950_v8 }
 0x4b7   :  { %3669 = vmatprep.subr.bf16.mxu0 %v3952_v5 }
 0x4ba   :  { %3670 = vmatpush3.bf16.msra.mxu0 %v3952_v5 }
 0x4bb   :  { %3671 = vmatprep.subr.bf16.mxu0 %v3954_v12 }
 0x4be   :  { %3672 = vmatpush3.bf16.msra.mxu0 %v3954_v12 }
 0x4bf   :  { %3673 = vmatprep.subr.bf16.mxu0 %v3956_v14 }
 0x4c2   :  { %3674 = vmatpush3.bf16.msra.mxu0 %v3956_v14 }
 0x4c3   :  { %3675 = vmatprep.subr.bf16.mxu0 %v3958_v16 }
 0x4c6   :  { %3676 = vmatpush3.bf16.msra.mxu0 %v3958_v16 }
 0x4c7   :  { %3677 = vmatprep.subr.bf16.mxu0 %v3960_v18 }
 0x4ca   :  { %3678 = vmatpush3.bf16.msra.mxu0 %v3960_v18  ;;  %v1735_v18 = vld [vmem:[#allocation2 + $0x8] sm:$0x1] }
 0x4cb   :  { %3679 = vmatprep.subr.bf16.mxu0 %v3963_v20 }
 0x4ce   :  { %3680 = vmatpush3.bf16.msra.mxu0 %v3963_v20 }
 0x4cf   :  { %3681 = vmatprep.subr.bf16.mxu0 %v3965_v21 }
 0x4d2   :  { %3682 = vmatpush3.bf16.msra.mxu0 %v3965_v21 }
 0x4d3   :  { %3707 = vmatprep.subr.bf16.mxu0 %v4611_v22 }
 0x55f   :  { %v1572_v23 = vpop.f32.mrf.mxu0 }
 0x561   :  { %v3661_v34 = vpop.f32.mrf.mxu0 }
 0x562   :  { %v1742_v34 = vld [vmem:[#allocation2 + $0x14] sm:$0x1] }
 0x575   :  { %v1645_v39 = vpop.f32.mrf.mxu0 }
 0x576   :  { %v1649_v41 = vmul.f32 %v1645_v39, %v1332_v37 }
 0x577   :  { %v3666_v45 = vpop.f32.mrf.mxu0 }
 0x578   :  { %v1650_v47 = vmul.f32 %v1649_v41, %v1572_v23  ;;  %v1655_v48 = vrot.slane %v1649_v41, %v4448_v25  ;;  %v1738_v23 = vld [vmem:[#allocation2 + $0xc] sm:$0xf] }
 0x57a   :  { %v1651_v50 = vsub.f32 %v1333_v42, %v1650_v47  ;;  %v1656_v51 = vmul.f32 %v1655_v48, %v4581_v0  ;;  %v1657_v44 = vmul.f32 %v1655_v48, %v4585_v24  ;;  %v1658_v52 = vmul.f32 %v1655_v48, %v4583_v35 }
 0x57b   :  { %v1659_v53 = vmul.f32 %v1655_v48, %v4589_v38 }
 0x57c   :  { %v1663_v54 = vrot.slane %v1651_v50, %v4448_v25 }
 0x57e   :  { %v1664_v46 = vadd.f32 %v1663_v54, %v1656_v51  ;;  %v1665_v55 = vadd.f32 %v1663_v54, %v1657_v44  ;;  %v1666_v56 = vadd.f32 %v1663_v54, %v1658_v52  ;;  %v1667_v57 = vadd.f32 %v1663_v54, %v1659_v53 }
 0x580   :  { %vm1668_vm10 = vcmp.gt.f32.partialorder %v1664_v46, 0.0  ;;  %vm1669_vm12 = vcmp.gt.f32.partialorder %v1665_v55, 0.0  ;;  %vm1670_vm14 = vcmp.gt.f32.partialorder %v1666_v56, 0.0  ;;  %vm1671_vm15 = vcmp.gt.f32.partialorder %v1667_v57, 0.0 }
 0x581   :  { %v1672_v58 = vmul.f32 0.1, %v1664_v46  ;;  %v1673_v59 = vmul.f32 0.1, %v1665_v55  ;;  %v1674_v60 = vmul.f32 0.1, %v1666_v56 }
 0x582   :  { %v1675_v0 = vmul.f32 0.1, %v1667_v57 }
 0x583   :  { %v1676_v62 = vsel %vm1668_vm10, %v1664_v46, %v1672_v58  ;;  %v1677_v24 = vsel %vm1669_vm12, %v1665_v55, %v1673_v59  ;;  %v1678_v63 = vsel %vm1670_vm14, %v1666_v56, %v1674_v60 }
 0x584   :  { %v1679_v35 = vsel %vm1671_vm15, %v1667_v57, %v1675_v0  ;;  %v3171_v2 = vpack.c.bf16 %v1676_v62, %v1676_v62  ;;  %v3172_v38 = vpack.c.bf16 %v1677_v24, %v1677_v24  ;;  %v3173_v1 = vpack.c.bf16 %v1678_v63, %v1678_v63 }
 0x585   :  { %v3174_v3 = vpack.c.bf16 %v1679_v35, %v1679_v35 }
 0x586   :  { %v1693_v4 = vshrl.u32 %v3171_v2, 16  ;;  %v1701_v6 = vshrl.u32 %v3172_v38, 16  ;;  %v1710_v7 = vshrl.u32 %v3173_v1, 16  ;;  %v1696_v29 = vshll.u32 %v3171_v2, 16 }
 0x587   :  { %v1718_v26 = vshrl.u32 %v3174_v3, 16  ;;  %v1704_v31 = vshll.u32 %v3172_v38, 16  ;;  %v1713_v32 = vshll.u32 %v3173_v1, 16  ;;  %v1721_v10 = vshll.u32 %v3174_v3, 16  ;;  %v4654_v38 = vld [vmem:[%s5014_s7 + $0x78] sm:$0xff] }
 0x588   :  { %v1695_v28 = vrot.slane %v1693_v4, 7  ;;  %v1703_v30 = vrot.slane %v1701_v6, 7  ;;  %v1712_v43 = vrot.slane %v1710_v7, 7 }
 0x589   :  { %v1720_v8 = vrot.slane %v1718_v26, 7 }
 0x58a   :  { %v1698_v5 = vor.u32 %v1696_v29, %v1695_v28  ;;  %v1699_v11 = vrot.slane %v1695_v28, 4  ;;  %v1706_v12 = vor.u32 %v1704_v31, %v1703_v30  ;;  %v1708_v13 = vrot.slane %v1703_v30, 4  ;;  %v4665_v30 = vld [vmem:[%s5014_s7 + $0x70] sm:$0xff] }
 0x58b   :  { %v1715_v14 = vor.u32 %v1713_v32, %v1712_v43  ;;  %v1716_v15 = vrot.slane %v1712_v43, 4  ;;  %v1723_v16 = vor.u32 %v1721_v10, %v1720_v8  ;;  %v1725_v17 = vrot.slane %v1720_v8, 4 }
 0x58c   :  { %v1707_v19 = vsel %vm4460_vm9, %v1699_v11, %v1706_v12  ;;  %v1732_v20 = vsel %vm4465_vm13, %v1698_v5, %v4481_v40  ;;  %v1736_v21 = vsel %vm4432_vm11, %v1708_v13, %v1735_v18  ;;  %v4676_v11 = vld [vmem:[%s5014_s7 + $0x68] sm:$0xff] }
 0x58d   :  { %v1724_v37 = vsel %vm4460_vm9, %v1716_v15, %v1723_v16  ;;  %1733 = vst [vmem:[#allocation2] sm:$0xf] %v1732_v20  ;;  %1734 = vst [vmem:[#allocation2 + $0x4] sm:$0xf] %v1707_v19  ;;  %v1739_v39 = vsel %vm4465_vm13, %v1715_v14, %v1738_v23  ;;  %v1743_v41 = vsel %vm4432_vm11, %v1725_v17, %v1742_v34  ;;  %v4687_v17 = vld [vmem:[%s5014_s7 + $0x60] sm:$0xff]  ;;  %v4698_v23 = vld [vmem:[%s5014_s7 + $0x58] sm:$0xff] }
 0x58e   :  { %1737 = vst [vmem:[#allocation2 + $0x8] sm:$0x1] %v1736_v21  ;;  %1741 = vst [vmem:[#allocation2 + $0x10] sm:$0xf] %v1724_v37  ;;  %v3967_v21 = vld [vmem:[#allocation6 + $0xb0] sm:$0xff]   ;;  %v4705_v37 = vld [vmem:[%s5014_s7 + $0x50] sm:$0xff] }
 0x58f   :  { %1744 = vst [vmem:[#allocation2 + $0x14] sm:$0x1] %v1743_v41  ;;  %1740 = vst [vmem:[#allocation2 + $0xc] sm:$0xf] %v1739_v39  ;;  %v3968_v39 = vld [vmem:[#allocation6 + $0xa8] sm:$0xff]   ;;  %v4713_v41 = vld [vmem:[%s5014_s7 + $0x48] sm:$0xff] }
 0x594   :  { %v1745_v40 = vld [vmem:[#allocation2] sm:$0xf]  ;;  %v4639_v42 = vld [vmem:[#allocation2 + $0x4] sm:$0xf] }
 0x595   :  { %v1765_v45 = vld [vmem:[#allocation2 + $0x8] sm:$0x1]  ;;  %v1768_v47 = vshrl.u32 %v1745_v40, 16  ;;  %v1771_v48 = vshll.u32 %v1745_v40, 16  ;;  %v1781_v61 = vshrl.u32 %v4639_v42, 16  ;;  %v3133_v50 = vcombine.low %v1745_v40, %v4639_v42  ;;  %v4720_v40 = vld [vmem:[%s5014_s7 + $0x40] sm:$0xff] }
 0x596   :  { %v1747_v51 = vld [vmem:[#allocation2 + $0xc] sm:$0xf]  ;;  %v4643_v44 = vld [vmem:[#allocation2 + $0x10] sm:$0xf]  ;;  %v1777_v36 = vshll.u32 %v4639_v42, 16  ;;  %v1787_v53 = vshll.u32 %v1765_v45, 16 }
 0x597   :  { %v1792_v27 = vshrl.u32 %v1747_v51, 16  ;;  %v1795_v52 = vshll.u32 %v1747_v51, 16  ;;  %v1770_v54 = vrot.slane %v1768_v47, 4  ;;  %v1773_v46 = vrot.slane %v1771_v48, 5  ;;  %3703 = vmatprep.mubr.bf16.mxu1 %v3133_v50  ;;  %v4648_v0 = vld [vmem:[#allocation2 + $0x14] sm:$0x1] }
 0x598   :  { %v1805_v55 = vshrl.u32 %v4643_v44, 16  ;;  %v3134_v56 = vcombine.low %v1747_v51, %v4643_v44  ;;  %v1779_v59 = vrot.slane %v1777_v36, 5  ;;  %v1783_v60 = vrot.slane %v1781_v61, 4  ;;  %v2046_v6 = vld [vmem:[#allocation2] sm:$0xe]  ;;  %v3970_v47 = vld [vmem:[#allocation6 + $0x98] sm:$0xff]  }
 0x599   :  { %v1794_v57 = vrot.slane %v1792_v27, 4  ;;  %v1797_v58 = vrot.slane %v1795_v52, 5  ;;  %v1774_v62 = vor.u32 %v1773_v46, %v1770_v54  ;;  %v1801_v24 = vshll.u32 %v4643_v44, 16  ;;  %v4741_v48 = vld [vmem:[%s5014_s7 + $0x28] sm:$0xff]  ;;  %v4748_v61 = vld [vmem:[%s5014_s7 + $0x20] sm:$0xff]  ;;  %v4755_v51 = vld [vmem:[%s5014_s7 + $0x18] sm:$0xff] }
 0x59a   :  { %3704 = vmatmul.mubr.bf16.vlgmr.msra.gmra.mxu1 %v3134_v56  ;;  %v1807_v63 = vrot.slane %v1805_v55, 4  ;;  %v1784_v35 = vor.u32 %v1783_v60, %v1779_v59  ;;  %v1811_v4 = vshll.u32 %v4648_v0, 16  ;;  %v2054_v7 = vrot.slane %v4639_v42, 5  ;;  %v4727_v42 = vld [vmem:[%s5014_s7 + $0x38] sm:$0xff]  ;;  %v3971_v50 = vld [vmem:[#allocation6 + $0x90] sm:$0xff]   ;;  %v4762_v27 = vld [vmem:[%s5014_s7 + $0x10] sm:$0xff] }
 0x59b   :  { %v1798_v2 = vor.u32 %v1797_v58, %v1794_v57  ;;  %3728 = vmatpush3.msra.mxu1 %v4654_v38  ;;  %3759 = vmatprep.mubr.msk.f32.mxu1 %vm4074_vm7, %v4073_v9  ;;  %v1775_v1 = vrot.slane %v1774_v62, 4  ;;  %v1803_v3 = vrot.slane %v1801_v24, 5  ;;  %v1789_v28 = vrot.slane %v1787_v53, 5  ;;  %v3972_v52 = vld [vmem:[#allocation6 + $0x88] sm:$0xff]   ;;  %v4770_v53 = vld [vmem:[%s5014_s7 + $0x8] sm:$0xff]  ;;  %v3973_v46 = vld [vmem:[#allocation6 + $0x80] sm:$0xff]  }
 0x59c   :  { %3729 = vmatprep.subr.mxu1 %v4073_v9  ;;  %v1785_v26 = vrot.slane %v1784_v35, 4  ;;  %v2056_v32 = vrot.slane %v2054_v7, 4  ;;  %v3143_v10 = vrot.slane %v2046_v6, 9  ;;  %v2057_v5 = vrot.slane %v1765_v45, 5  ;;  %v4734_v45 = vld [vmem:[%s5014_s7 + $0x30] sm:$0xff]  ;;  %v4777_v54 = vld [vmem:[%s5014_s7] sm:$0xff] }
 0x59d   :  { %v1799_v29 = vrot.slane %v1798_v2, 4  ;;  %3730 = vmatpush3.msra.mxu1 %v4665_v30  ;;  %v1780_v31 = vsel %vm4197_vm4, %v1775_v1, %v1779_v59  ;;  %v1808_v43 = vor.u32 %v1807_v63, %v1803_v3  ;;  %v1813_v15 = vrot.slane %v1811_v4, 5 }
 0x59e   :  { %3731 = vmatprep.subr.mxu1 %v4073_v9  ;;  %v1790_v8 = vsel %vm4197_vm4, %v1785_v26, %v1789_v28  ;;  %v2058_v16 = vsel %vm4213_vm6, %v2056_v32, %v2057_v5  ;;  %v2055_v20 = vsel %vm4213_vm6, %v3143_v10, %v2054_v7  ;;  %v2061_v36 = vrot.slane %v4643_v44, 5  ;;  %v2047_v44 = vld [vmem:[#allocation2 + $0xc] sm:$0xe] }
 0x59f   :  { %3732 = vmatpush3.msra.mxu1 %v4676_v11  ;;  %v3123_v12 = vcombine.low %v1780_v31, %v1790_v8  ;;  %v1804_v13 = vsel %vm4197_vm4, %v1799_v29, %v1803_v3  ;;  %v1809_v14 = vrot.slane %v1808_v43, 4  ;;  %v3145_v34 = vcombine.low %v2055_v20, %v2058_v16 }
 0x5a0   :  { %3733 = vmatprep.subr.mxu1 %v4073_v9  ;;  %v2063_v55 = vrot.slane %v2061_v36, 4  ;;  %v3144_v56 = vrot.slane %v2047_v44, 9  ;;  %v2064_v57 = vrot.slane %v4648_v0, 5 }
 0x5a1   :  { %3734 = vmatpush3.msra.mxu1 %v4687_v17  ;;  %3683 = vmatprep.mubr.bf16.mxu0 %v3123_v12  ;;  %v1814_v18 = vsel %vm4197_vm4, %v1809_v14, %v1813_v15 }
 0x5a2   :  { %3735 = vmatprep.subr.mxu1 %v4073_v9  ;;  %v3124_v19 = vcombine.low %v1804_v13, %v1814_v18  ;;  %v2065_v58 = vsel %vm4213_vm6, %v2063_v55, %v2064_v57  ;;  %v2062_v59 = vsel %vm4213_vm6, %v3144_v56, %v2061_v36 }
 0x5a3   :  { %3736 = vmatpush3.msra.mxu1 %v4698_v23  ;;  %v3146_v60 = vcombine.low %v2062_v59, %v2065_v58  ;;  %v4844_v58 = vld [vmem:[%s5015_s8] sm:$0xff]  ;;  %s4075_s8 = smov [#allocation8]  }
 0x5a4   :  { %3737 = vmatprep.subr.mxu1 %v4073_v9  ;;  %3684 = vmatmul.mubr.bf16.vlgmr.msra.gmra.mxu0 %v3124_v19  ;;  %v2528_v59 = vld [vmem:[%s5007_s0] sm:$0xf]  ;;  %s3024_s17 = sshll.u32 %s4075_s8, 4  ;;  %s3025_s17 = int_to_ptr.vmem [resolvable:$true] %s3024_s17 }
 0x5a5   :  { %3738 = vmatpush3.msra.mxu1 %v4705_v37  ;;  %3708 = vmatpush3.bf16.msra.mxu0 %v4611_v22  ;;  %v3969_v22 = vld [vmem:[#allocation6 + $0xa0] sm:$0xff]   ;;  %p4048_p11 = scmp.lt.s32.totalorder %s3025_s17, %s3025_s17 }
 0x5a6   :  { %3723 = vmatprep.mubr.bf16.mxu0 %v3145_v34  ;;  %3709 = vmatprep.subr.bf16.mxu0 %v3967_v21 }
 0x5a7   :  { %3739 = vmatprep.subr.mxu1 %v4073_v9 }
 0x5a8   :  { %3740 = vmatpush3.msra.mxu1 %v4713_v41 }
 0x5a9   :  { %3741 = vmatprep.subr.mxu1 %v4073_v9  ;;  %3710 = vmatpush3.bf16.msra.mxu0 %v3967_v21 }
 0x5aa   :  { %3742 = vmatpush3.msra.mxu1 %v4720_v40  ;;  %3711 = vmatprep.subr.bf16.mxu0 %v3968_v39 }
 0x5ab   :  { %3743 = vmatprep.subr.mxu1 %v4073_v9 }
 0x5ac   :  { %3744 = vmatpush3.msra.mxu1 %v4727_v42 }
 0x5ad   :  { %3745 = vmatprep.subr.mxu1 %v4073_v9  ;;  %3712 = vmatpush3.bf16.msra.mxu0 %v3968_v39 }
 0x5ae   :  { %3746 = vmatpush3.msra.mxu1 %v4734_v45  ;;  %3713 = vmatprep.subr.bf16.mxu0 %v3969_v22 }
 0x5af   :  { %3747 = vmatprep.subr.mxu1 %v4073_v9 }
 0x5b0   :  { %3748 = vmatpush3.msra.mxu1 %v4741_v48 }
 0x5b1   :  { %3749 = vmatprep.subr.mxu1 %v4073_v9  ;;  %3714 = vmatpush3.bf16.msra.mxu0 %v3969_v22 }
 0x5b2   :  { %3750 = vmatpush3.msra.mxu1 %v4748_v61  ;;  %3715 = vmatprep.subr.bf16.mxu0 %v3970_v47 }
 0x5b3   :  { %3751 = vmatprep.subr.mxu1 %v4073_v9 }
 0x5b4   :  { %3752 = vmatpush3.msra.mxu1 %v4755_v51 }
 0x5b5   :  { %3753 = vmatprep.subr.mxu1 %v4073_v9  ;;  %3716 = vmatpush3.bf16.msra.mxu0 %v3970_v47 }
 0x5b6   :  { %3754 = vmatpush3.msra.mxu1 %v4762_v27  ;;  %3717 = vmatprep.subr.bf16.mxu0 %v3971_v50 }
 0x5b7   :  { %3755 = vmatprep.subr.mxu1 %v4073_v9 }
 0x5b8   :  { %3756 = vmatpush3.msra.mxu1 %v4770_v53 }
 0x5b9   :  { %3757 = vmatprep.subr.mxu1 %v4073_v9  ;;  %3718 = vmatpush3.bf16.msra.mxu0 %v3971_v50 }
 0x5ba   :  { %3758 = vmatpush3.msra.mxu1 %v4777_v54  ;;  %3719 = vmatprep.subr.bf16.mxu0 %v3972_v52 }
 0x5bb   :  { %3797 = vmatprep.subr.mxu1 %v4073_v9 }
 0x5bd   :  { %3720 = vmatpush3.bf16.msra.mxu0 %v3972_v52 }
 0x5be   :  { %3721 = vmatprep.subr.bf16.mxu0 %v3973_v46 }
 0x5c1   :  { %3722 = vmatpush3.bf16.msra.mxu0 %v3973_v46 }
 0x5c2   :  { %3762 = vmatprep.subr.mxu0 %v4073_v9 }
 0x5c4   :  { %3724 = vmatmul.mubr.bf16.vlgmr.msra.gmra.mxu0 %v3146_v60 }
 0x5c5   :  { %3763 = vmatpush3.msra.mxu0 %v4654_v38  ;;  %3794 = vmatprep.mubr.msk.f32.mxu0 %vm4074_vm7, %v4073_v9 }
 0x5c6   :  { %3764 = vmatprep.subr.mxu0 %v4073_v9 }
 0x5c7   :  { %3765 = vmatpush3.msra.mxu0 %v4665_v30 }
 0x5c8   :  { %3766 = vmatprep.subr.mxu0 %v4073_v9 }
 0x5c9   :  { %3767 = vmatpush3.msra.mxu0 %v4676_v11 }
 0x5ca   :  { %3768 = vmatprep.subr.mxu0 %v4073_v9 }
 0x5cb   :  { %3769 = vmatpush3.msra.mxu0 %v4687_v17 }
 0x5cc   :  { %3770 = vmatprep.subr.mxu0 %v4073_v9 }
 0x5cd   :  { %3771 = vmatpush3.msra.mxu0 %v4698_v23 }
 0x5ce   :  { %3772 = vmatprep.subr.mxu0 %v4073_v9 }
 0x5cf   :  { %3773 = vmatpush3.msra.mxu0 %v4705_v37 }
 0x5d0   :  { %3774 = vmatprep.subr.mxu0 %v4073_v9 }
 0x5d1   :  { %3775 = vmatpush3.msra.mxu0 %v4713_v41 }
 0x5d2   :  { %3776 = vmatprep.subr.mxu0 %v4073_v9 }
 0x5d3   :  { %3777 = vmatpush3.msra.mxu0 %v4720_v40 }
 0x5d4   :  { %3778 = vmatprep.subr.mxu0 %v4073_v9 }
 0x5d5   :  { %3779 = vmatpush3.msra.mxu0 %v4727_v42 }
 0x5d6   :  { %3780 = vmatprep.subr.mxu0 %v4073_v9 }
 0x5d7   :  { %3781 = vmatpush3.msra.mxu0 %v4734_v45 }
 0x5d8   :  { %3782 = vmatprep.subr.mxu0 %v4073_v9 }
 0x5d9   :  { %3783 = vmatpush3.msra.mxu0 %v4741_v48 }
 0x5da   :  { %3784 = vmatprep.subr.mxu0 %v4073_v9 }
 0x5db   :  { %3785 = vmatpush3.msra.mxu0 %v4748_v61 }
 0x5dc   :  { %3786 = vmatprep.subr.mxu0 %v4073_v9 }
 0x5dd   :  { %3787 = vmatpush3.msra.mxu0 %v4755_v51 }
 0x5de   :  { %3788 = vmatprep.subr.mxu0 %v4073_v9 }
 0x5df   :  { %3789 = vmatpush3.msra.mxu0 %v4762_v27 }
 0x5e0   :  { %3790 = vmatprep.subr.mxu0 %v4073_v9 }
 0x5e1   :  { %3791 = vmatpush3.msra.mxu0 %v4770_v53 }
 0x5e2   :  { %3792 = vmatprep.subr.mxu0 %v4073_v9 }
 0x5e3   :  { %3793 = vmatpush3.msra.mxu0 %v4777_v54 }
 0x5e4   :  { %3819 = vmatprep.subr.mxu0 %v4073_v9 }
 0x65a   :  { %v3705_v62 = vpop.f32.mrf.mxu1 }
 0x65c   :  { %v2031_v63 = vpop.f32.mrf.mxu1 }
 0x65e   :  { %v3706_v2 = vpop.f32.mrf.mxu1 }
 0x660   :  { %v2034_v6 = vpop.f32.mrf.mxu1 }
 0x664   :  { %v3685_v49 = vpop.f32.mrf.mxu0 }
 0x665   :  { %v2040_v26 = vadd.f32 %v3705_v62, %v3685_v49  ;;  %v2529_v49 = vld [vmem:[%s5007_s0 + $0x4] sm:$0xf]  ;;  %v3974_v62 = vld [vmem:[%s5011_s4 + $0x18] sm:$0xff]  }
 0x666   :  { %v1922_v0 = vpop.f32.mrf.mxu0 }
 0x667   :  { %v2032_v4 = vadd.f32 %v2031_v63, %v1922_v0 }
 0x668   :  { %v3686_v24 = vpop.f32.mrf.mxu0 }
 0x669   :  { %v2043_v43 = vadd.f32 %v3706_v2, %v3686_v24  ;;  %v2538_v2 = vshll.u32 %v2528_v59, 16 }
 0x66a   :  { %v1925_v35 = vpop.f32.mrf.mxu0 }
 0x66b   :  { %v2035_v28 = vadd.f32 %v2034_v6, %v1925_v35  ;;  %v2535_v35 = vshrl.u32 %v2528_v59, 16  ;;  %v2548_v6 = vshrl.u32 %v2529_v49, 16 }
 0x684   :  { %v3725_v1 = vpop.f32.mrf.mxu0 }
 0x685   :  { %v4823_v32 = vadd.f32 %v3725_v1, %v2040_v26 }
 0x686   :  { %v2173_v3 = vpop.f32.mrf.mxu0 }
 0x687   :  { %v4821_v29 = vadd.f32 %v2173_v3, %v2032_v4  ;;  %v2205_v14 = vmul.f32 %v4823_v32, %v4823_v32  ;;  %v2544_v4 = vshll.u32 %v2529_v49, 16  ;;  %v2533_v49 = vld [vmem:[%s5007_s0 + $0x14] sm:$0x1] }
 0x688   :  { %v3726_v7 = vpop.f32.mrf.mxu0 }
 0x689   :  { %v2203_v10 = vmul.f32 %v4821_v29, %v4821_v29  ;;  %v4829_v5 = vadd.f32 %v3726_v7, %v2043_v43  ;;  %v2540_v43 = vrot.slane %v2538_v2, 5  ;;  %v3976_v2 = vld [vmem:[%s5011_s4 + $0x8] sm:$0xff]  }
 0x68a   :  { %v2176_v31 = vpop.f32.mrf.mxu0 }
 0x68b   :  { %v4825_v8 = vadd.f32 %v2176_v31, %v2035_v28  ;;  %v2206_v18 = vmul.f32 %v4829_v5, %v4829_v5  ;;  %v2537_v28 = vrot.slane %v2535_v35, 4  ;;  %v2578_v35 = vshll.u32 %v2533_v49, 16 }
 0x68d   :  { %v2194_v12 = vadd.f32 %v4825_v8, %v4821_v29  ;;  %v2204_v13 = vmul.f32 %v4825_v8, %v4825_v8 }
 0x68f   :  { %v2195_v15 = vadd.f32 %v2194_v12, %v4823_v32  ;;  %v2207_v16 = vadd.f32 %v2204_v13, %v2203_v10  ;;  %v2546_v10 = vrot.slane %v2544_v4, 5  ;;  %v2550_v12 = vrot.slane %v2548_v6, 4  ;;  %v2530_v13 = vld [vmem:[%s5007_s0 + $0x8] sm:$0x1]  ;;  %v3977_v6 = vld [vmem:[%s5011_s4] sm:$0xff]  }
 0x690   :  { %v2580_v4 = vrot.slane %v2578_v35, 5 }
 0x691   :  { %v2196_v19 = vadd.f32 %v2195_v15, %v4829_v5  ;;  %v2208_v20 = vadd.f32 %v2207_v16, %v2205_v14  ;;  %v2541_v15 = vor.u32 %v2540_v43, %v2537_v28  ;;  %v2551_v16 = vor.u32 %v2550_v12, %v2546_v10 }
 0x693   :  { %v2197_v21 = vrot.slane %v2196_v19, 4  ;;  %v2209_v34 = vadd.f32 %v2208_v20, %v2206_v18  ;;  %v2554_v18 = vshll.u32 %v2530_v13, 16  ;;  %v2542_v20 = vrot.slane %v2541_v15, 4 }
 0x695   :  { %v2198_v39 = vadd.f32 %v2197_v21, %v2196_v19  ;;  %v2210_v22 = vrot.slane %v2209_v34, 4  ;;  %v2531_v19 = vld [vmem:[%s5007_s0 + $0xc] sm:$0xf]  ;;  %v2552_v21 = vrot.slane %v2551_v16, 4 }
 0x697   :  { %v2199_v47 = vrot.slane %v2198_v39, 2  ;;  %v2211_v50 = vadd.f32 %v2210_v22, %v2209_v34  ;;  %v2556_v34 = vrot.slane %v2554_v18, 5  ;;  %v2559_v22 = vshrl.u32 %v2531_v19, 16 }
 0x699   :  { %v2200_v52 = vadd.f32 %v2199_v47, %v2198_v39  ;;  %v2212_v36 = vrot.slane %v2211_v50, 2  ;;  %v2532_v39 = vld [vmem:[%s5007_s0 + $0x10] sm:$0xf]  ;;  %v2562_v47 = vshll.u32 %v2531_v19, 16 }
 0x69b   :  { %v2201_v46 = vrot.slane %v2200_v52, 1  ;;  %v2213_v44 = vadd.f32 %v2212_v36, %v2211_v50  ;;  %v2568_v50 = vshll.u32 %v2532_v39, 16  ;;  %v2547_v36 = vsel %vm4197_vm4, %v2542_v20, %v2546_v10 }
 0x69d   :  { %v2202_v55 = vadd.f32 %v2201_v46, %v2200_v52  ;;  %v2214_v56 = vrot.slane %v2213_v44, 1  ;;  %v2572_v52 = vshrl.u32 %v2532_v39, 16  ;;  %v2557_v46 = vsel %vm4197_vm4, %v2552_v21, %v2556_v34 }
 0x69f   :  { %3760 = vmatmul.mubr.f32.vlgmr.msra.gmra.mxu1 %v2202_v55  ;;  %v2215_v57 = vadd.f32 %v2214_v56, %v2213_v44  ;;  %v2561_v44 = vrot.slane %v2559_v22, 4  ;;  %v3157_v55 = vcombine.low %v2547_v36, %v2557_v46  ;;  %v2564_v56 = vrot.slane %v2562_v47, 5 }
 0x6a0   :  { %3798 = vmatpush3.msra.mxu1 %v4844_v58  ;;  %3799 = vmatprep.mubr.msk.f32.mxu1 %vm4074_vm7, %v4073_v9  ;;  %v2574_v59 = vrot.slane %v2572_v52, 4 }
 0x6a1   :  { %3795 = vmatmul.mubr.f32.vlgmr.msra.gmra.mxu0 %v2215_v57  ;;  %3802 = vmatprep.subr.mxu1 %v4073_v9  ;;  %v2570_v57 = vrot.slane %v2568_v50, 5 }
 0x6a2   :  { %3820 = vmatpush3.msra.mxu0 %v4654_v38  ;;  %3851 = vmatprep.mubr.msk.f32.mxu0 %vm4074_vm7, %v4073_v9 }
 0x6a3   :  { %3821 = vmatprep.subr.mxu0 %v4073_v9 }
 0x6a4   :  { %3822 = vmatpush3.msra.mxu0 %v4665_v30 }
 0x6a5   :  { %3823 = vmatprep.subr.mxu0 %v4073_v9 }
 0x6a6   :  { %3824 = vmatpush3.msra.mxu0 %v4676_v11 }
 0x6a7   :  { %3825 = vmatprep.subr.mxu0 %v4073_v9 }
 0x6a8   :  { %3826 = vmatpush3.msra.mxu0 %v4687_v17 }
 0x6a9   :  { %3827 = vmatprep.subr.mxu0 %v4073_v9 }
 0x6aa   :  { %3828 = vmatpush3.msra.mxu0 %v4698_v23 }
 0x6ab   :  { %3829 = vmatprep.subr.mxu0 %v4073_v9 }
 0x6ac   :  { %3830 = vmatpush3.msra.mxu0 %v4705_v37 }
 0x6ad   :  { %3831 = vmatprep.subr.mxu0 %v4073_v9 }
 0x6ae   :  { %3832 = vmatpush3.msra.mxu0 %v4713_v41 }
 0x6af   :  { %3833 = vmatprep.subr.mxu0 %v4073_v9 }
 0x6b0   :  { %3834 = vmatpush3.msra.mxu0 %v4720_v40 }
 0x6b1   :  { %3835 = vmatprep.subr.mxu0 %v4073_v9 }
 0x6b2   :  { %3836 = vmatpush3.msra.mxu0 %v4727_v42 }
 0x6b3   :  { %3837 = vmatprep.subr.mxu0 %v4073_v9 }
 0x6b4   :  { %3838 = vmatpush3.msra.mxu0 %v4734_v45 }
 0x6b5   :  { %3839 = vmatprep.subr.mxu0 %v4073_v9 }
 0x6b6   :  { %3840 = vmatpush3.msra.mxu0 %v4741_v48 }
 0x6b7   :  { %3841 = vmatprep.subr.mxu0 %v4073_v9 }
 0x6b8   :  { %3842 = vmatpush3.msra.mxu0 %v4748_v61 }
 0x6b9   :  { %3843 = vmatprep.subr.mxu0 %v4073_v9 }
 0x6ba   :  { %3844 = vmatpush3.msra.mxu0 %v4755_v51 }
 0x6bb   :  { %3845 = vmatprep.subr.mxu0 %v4073_v9 }
 0x6bc   :  { %3846 = vmatpush3.msra.mxu0 %v4762_v27 }
 0x6bd   :  { %3847 = vmatprep.subr.mxu0 %v4073_v9 }
 0x6be   :  { %3848 = vmatpush3.msra.mxu0 %v4770_v53 }
 0x6bf   :  { %3849 = vmatprep.subr.mxu0 %v4073_v9 }
 0x6c0   :  { %3850 = vmatpush3.msra.mxu0 %v4777_v54 }
 0x6c1   :  { %3889 = vmatprep.subr.mxu0 %v4073_v9 }
 0x75f   :  { %v2282_v60 = vpop.f32.mrf.mxu1 }
 0x760   :  { %v2356_v0 = vmul.f32 0.001953125, %v2282_v60  ;;  %v3975_v60 = vld [vmem:[%s5011_s4 + $0x10] sm:$0xff]  }
 0x761   :  { %v3761_v24 = vpop.f32.mrf.mxu1  ;;  %v2352_v63 = vpop.f32.mrf.mxu0 }
 0x762   :  { %v2358_v1 = vmul.f32 %v2356_v0, %v2356_v0  ;;  %v2357_v3 = vmul.f32 0.001953125, %v2352_v63  ;;  %3800 = vmatmul.mubr.msk.f32.vlgmr.msra.gmra.mxu1 %vm637_vm8, %v2356_v0  ;;  %v2565_v24 = vor.u32 %v2564_v56, %v2561_v44  ;;  %v2575_v63 = vor.u32 %v2574_v59, %v2570_v57 }
 0x763   :  { %v3796_v7 = vpop.f32.mrf.mxu0  ;;  %3803 = vmatpush3.msra.mxu1 %v4844_v58  ;;  %3804 = vmatprep.mubr.msk.f32.mxu1 %vm4074_vm7, %v4073_v9 }
 0x764   :  { %v2359_v26 = vsub.f32 %v2357_v3, %v2358_v1  ;;  %3807 = vmatprep.subr.bf16.mxu1 %v3974_v62  ;;  %v2566_v1 = vrot.slane %v2565_v24, 4  ;;  %v2576_v3 = vrot.slane %v2575_v63, 4 }
 0x766   :  { %v2360_v31 = vmax.f32 %v2359_v26, 0.0  ;;  %v2581_v7 = vsel %vm4197_vm4, %v2576_v3, %v2580_v4 }
 0x768   :  { %v2361_v14 = vadd.f32 1e-05, %v2360_v31 }
 0x76a   :  { %3982 = vrsqrt.f32 %v2361_v14 }
 0x777   :  { %v3983_v0 = vpop.eup %3982 }
 0x778   :  { %3805 = vmatmul.mubr.msk.f32.vlgmr.msra.gmra.mxu1 %vm637_vm8, %v3983_v0 }
 0x779   :  { %3808 = vmatpush3.bf16.msra.mxu1 %v3974_v62  ;;  %3815 = vmatprep.mubr.msk.bf16.mxu1 %vm200_vm2, %v3157_v55  ;;  %v2571_v62 = vsel %vm4197_vm4, %v2566_v1, %v2570_v57 }
 0x77a   :  { %3809 = vmatprep.subr.bf16.mxu1 %v3975_v60  ;;  %v3158_v26 = vcombine.low %v2571_v62, %v2581_v7  ;;  %v2675_v62 = vld [vmem:[%s5012_s5 + $0x3] sm:$0x1] }
 0x77d   :  { %3810 = vmatpush3.bf16.msra.mxu1 %v3975_v60 }
 0x77e   :  { %3811 = vmatprep.subr.bf16.mxu1 %v3976_v2 }
 0x781   :  { %3812 = vmatpush3.bf16.msra.mxu1 %v3976_v2 }
 0x782   :  { %3813 = vmatprep.subr.bf16.mxu1 %v3977_v6 }
 0x785   :  { %3814 = vmatpush3.bf16.msra.mxu1 %v3977_v6 }
 0x786   :  { %3854 = vmatprep.subr.mxu1 %v4073_v9 }
 0x788   :  { %3816 = vmatmul.mubr.msk.bf16.vlgmr.msra.gmra.mxu1 %vm200_vm2, %v3158_v26 }
 0x789   :  { %3855 = vmatpush3.msra.mxu1 %v4654_v38  ;;  %3886 = vmatprep.mubr.msk.f32.mxu1 %vm4074_vm7, %v4073_v9 }
 0x78a   :  { %3856 = vmatprep.subr.mxu1 %v4073_v9 }
 0x78b   :  { %3857 = vmatpush3.msra.mxu1 %v4665_v30  ;;  %v2192_v30 = vld [vmem:[%s5012_s5 + $0x2] sm:$0x1]  ;;  %s4043_s5 = scalar_lea.vmem %s3025_s17, 512 }
 0x78c   :  { %3858 = vmatprep.subr.mxu1 %v4073_v9  ;;  %p4044_p10 = scmp.ne.s32.totalorder %s3025_s17, %s4043_s5  ;;  %p4049_p12 = scmp.lt.s32.totalorder %s4043_s5, %s4043_s5 }
 0x78d   :  { %3859 = vmatpush3.msra.mxu1 %v4676_v11 }
 0x78e   :  { %3860 = vmatprep.subr.mxu1 %v4073_v9  ;;  %p4050_p13 = por %p4049_p12, %p4048_p11 }
 0x78f   :  { %3861 = vmatpush3.msra.mxu1 %v4687_v17 }
 0x790   :  { %3862 = vmatprep.subr.mxu1 %v4073_v9  ;;  %p4051_p0 = pnand %p4050_p13, %p4044_p10 }
 0x791   :  { %3863 = vmatpush3.msra.mxu1 %v4698_v23  ;;  %v2193_v23 = vld [vmem:[%s5013_s6 + $0x2] sm:$0x1] }
 0x792   :  { %3864 = vmatprep.subr.mxu1 %v4073_v9 }
 0x793   :  { %3865 = vmatpush3.msra.mxu1 %v4705_v37 }
 0x794   :  { %3866 = vmatprep.subr.mxu1 %v4073_v9 }
 0x795   :  { %3867 = vmatpush3.msra.mxu1 %v4713_v41 }
 0x796   :  { %3868 = vmatprep.subr.mxu1 %v4073_v9 }
 0x797   :  { %3869 = vmatpush3.msra.mxu1 %v4720_v40 }
 0x798   :  { %3870 = vmatprep.subr.mxu1 %v4073_v9 }
 0x799   :  { %3871 = vmatpush3.msra.mxu1 %v4727_v42 }
 0x79a   :  { %3872 = vmatprep.subr.mxu1 %v4073_v9 }
 0x79b   :  { %3873 = vmatpush3.msra.mxu1 %v4734_v45 }
 0x79c   :  { %3874 = vmatprep.subr.mxu1 %v4073_v9 }
 0x79d   :  { %3875 = vmatpush3.msra.mxu1 %v4741_v48 }
 0x79e   :  { %3876 = vmatprep.subr.mxu1 %v4073_v9 }
 0x79f   :  { %3877 = vmatpush3.msra.mxu1 %v4748_v61 }
 0x7a0   :  { %3878 = vmatprep.subr.mxu1 %v4073_v9 }
 0x7a1   :  { %3879 = vmatpush3.msra.mxu1 %v4755_v51 }
 0x7a2   :  { %3880 = vmatprep.subr.mxu1 %v4073_v9 }
 0x7a3   :  { %3881 = vmatpush3.msra.mxu1 %v4762_v27 }
 0x7a4   :  { %3882 = vmatprep.subr.mxu1 %v4073_v9 }
 0x7a5   :  { %3883 = vmatpush3.msra.mxu1 %v4770_v53 }
 0x7a6   :  { %3884 = vmatprep.subr.mxu1 %v4073_v9 }
 0x7a7   :  { %3885 = vmatpush3.msra.mxu1 %v4777_v54 }
 0x822   :  { %v2432_v33 = vpop.f32.mrf.mxu1 }
 0x824   :  { %v3801_v38 = vpop.f32.mrf.mxu1 }
 0x838   :  { %v2505_v11 = vpop.f32.mrf.mxu1 }
 0x839   :  { %v2509_v17 = vmul.f32 %v2505_v11, %v2192_v30 }
 0x83a   :  { %v3806_v37 = vpop.f32.mrf.mxu1 }
 0x83b   :  { %v2510_v41 = vmul.f32 %v2509_v17, %v2432_v33  ;;  %v2515_v40 = vrot.slane %v2509_v17, %v4448_v25 }
 0x83d   :  { %v2511_v42 = vsub.f32 %v2193_v23, %v2510_v41  ;;  %v2516_v45 = vmul.f32 %v2515_v40, %v4821_v29  ;;  %v2517_v48 = vmul.f32 %v2515_v40, %v4825_v8  ;;  %v2518_v61 = vmul.f32 %v2515_v40, %v4823_v32 }
 0x83e   :  { %v2519_v51 = vmul.f32 %v2515_v40, %v4829_v5 }
 0x83f   :  { %v2523_v27 = vrot.slane %v2511_v42, %v4448_v25 }
 0x841   :  { %v4975_v53 = vadd.f32 %v2523_v27, %v2516_v45  ;;  %v4977_v54 = vadd.f32 %v2523_v27, %v2517_v48  ;;  %v4979_v28 = vadd.f32 %v2523_v27, %v2518_v61  ;;  %v4981_v31 = vadd.f32 %v2523_v27, %v2519_v51 }
 0x848   :  { %v3817_v43 = vpop.f32.mrf.mxu1 }
 0x849   :  { %v2688_v32 = vmul.f32 %v3817_v43, %v3817_v43 }
 0x84a   :  { %v2660_v10 = vpop.f32.mrf.mxu1 }
 0x84b   :  { %v2686_v13 = vmul.f32 %v2660_v10, %v2660_v10 }
 0x84c   :  { %v3818_v12 = vpop.f32.mrf.mxu1 }
 0x84d   :  { %v2689_v16 = vmul.f32 %v3818_v12, %v3818_v12 }
 0x84e   :  { %v2663_v29 = vpop.f32.mrf.mxu1 }
 0x84f   :  { %v2677_v8 = vadd.f32 %v2663_v29, %v2660_v10  ;;  %v2687_v14 = vmul.f32 %v2663_v29, %v2663_v29 }
 0x851   :  { %v2678_v15 = vadd.f32 %v3817_v43, %v2677_v8  ;;  %v2690_v5 = vadd.f32 %v2687_v14, %v2686_v13 }
 0x853   :  { %v2679_v18 = vadd.f32 %v3818_v12, %v2678_v15  ;;  %v2691_v19 = vadd.f32 %v2690_v5, %v2688_v32 }
 0x855   :  { %v2680_v20 = vrot.slane %v2679_v18, 4  ;;  %v2692_v21 = vadd.f32 %v2691_v19, %v2689_v16 }
 0x857   :  { %v2681_v34 = vadd.f32 %v2680_v20, %v2679_v18  ;;  %v2693_v39 = vrot.slane %v2692_v21, 4 }
 0x859   :  { %v2682_v22 = vrot.slane %v2681_v34, 2  ;;  %v2694_v47 = vadd.f32 %v2693_v39, %v2692_v21 }
 0x85b   :  { %v2683_v50 = vadd.f32 %v2682_v22, %v2681_v34  ;;  %v2695_v52 = vrot.slane %v2694_v47, 2 }
 0x85d   :  { %v2684_v36 = vrot.slane %v2683_v50, 1  ;;  %v2696_v46 = vadd.f32 %v2695_v52, %v2694_v47 }
 0x85f   :  { %v2685_v44 = vadd.f32 %v2684_v36, %v2683_v50  ;;  %v2697_v55 = vrot.slane %v2696_v46, 1 }
 0x861   :  { %3852 = vmatmul.mubr.f32.vlgmr.msra.gmra.mxu0 %v2685_v44  ;;  %v2698_v56 = vadd.f32 %v2697_v55, %v2696_v46 }
 0x862   :  { %3890 = vmatpush3.msra.mxu0 %v4844_v58  ;;  %3891 = vmatprep.mubr.msk.f32.mxu0 %vm4074_vm7, %v4073_v9 }
 0x863   :  { %3887 = vmatmul.mubr.f32.vlgmr.msra.gmra.mxu1 %v2698_v56  ;;  %3894 = vmatprep.subr.mxu0 %v4073_v9 }
 0x921   :  { %v2765_v57 = vpop.f32.mrf.mxu0 }
 0x922   :  { %v2839_v59 = vmul.f32 0.001953125, %v2765_v57 }
 0x923   :  { %v3853_v60 = vpop.f32.mrf.mxu0  ;;  %v2835_v49 = vpop.f32.mrf.mxu1 }
 0x924   :  { %v2841_v0 = vmul.f32 %v2839_v59, %v2839_v59  ;;  %v2840_v24 = vmul.f32 0.001953125, %v2835_v49  ;;  %3892 = vmatmul.mubr.msk.f32.vlgmr.msra.gmra.mxu0 %vm637_vm8, %v2839_v59 }
 0x925   :  { %v3888_v63 = vpop.f32.mrf.mxu1  ;;  %3895 = vmatpush3.msra.mxu0 %v4844_v58  ;;  %3896 = vmatprep.mubr.msk.f32.mxu0 %vm4074_vm7, %v4073_v9  ;;  %v2676_v58 = vld [vmem:[%s5013_s6 + $0x3] sm:$0x1] }
 0x926   :  { %v2842_v35 = vsub.f32 %v2840_v24, %v2841_v0 }
 0x928   :  { %v2843_v2 = vmax.f32 %v2842_v35, 0.0 }
 0x92a   :  { %v2844_v1 = vadd.f32 1e-05, %v2843_v2 }
 0x92c   :  { %3984 = vrsqrt.f32 %v2844_v1 }
 0x939   :  { %v3985_v3 = vpop.eup %3984 }
 0x93a   :  { %3897 = vmatmul.mubr.msk.f32.vlgmr.msra.gmra.mxu0 %vm637_vm8, %v3985_v3 }
 0x9e4   :  { %v2915_v4 = vpop.f32.mrf.mxu0 }
 0x9e6   :  { %v3893_v6 = vpop.f32.mrf.mxu0 }
 0x9fa   :  { %v2988_v7 = vpop.f32.mrf.mxu0 }
 0x9fb   :  { %v2992_v26 = vmul.f32 %v2988_v7, %v2675_v62 }
 0x9fc   :  { %v3898_v9 = vpop.f32.mrf.mxu0 }
 0x9fd   :  { %v2993_v33 = vmul.f32 %v2992_v26, %v2915_v4  ;;  %v2998_v38 = vrot.slane %v2992_v26, %v4448_v25 }
 0x9ff   :  { %v2994_v30 = vsub.f32 %v2676_v58, %v2993_v33  ;;  %v2999_v11 = vmul.f32 %v2998_v38, %v2660_v10  ;;  %v3000_v17 = vmul.f32 %v2998_v38, %v2663_v29  ;;  %v3001_v23 = vmul.f32 %v3817_v43, %v2998_v38 }
 0xa00   :  { %v3002_v37 = vmul.f32 %v3818_v12, %v2998_v38 }
 0xa01   :  { %v3006_v41 = vrot.slane %v2994_v30, %v4448_v25 }
 0xa03   :  { %v3007_v40 = vadd.f32 %v3006_v41, %v2999_v11  ;;  %v3008_v42 = vadd.f32 %v3006_v41, %v3000_v17  ;;  %v3009_v45 = vadd.f32 %v3006_v41, %v3001_v23  ;;  %v3010_v48 = vadd.f32 %v3006_v41, %v3002_v37 }
 0xa05   :  { %v3011_v61 = vadd.f32 %v3007_v40, %v4975_v53  ;;  %v3012_v51 = vadd.f32 %v3008_v42, %v4977_v54  ;;  %v3013_v27 = vadd.f32 %v3009_v45, %v4979_v28  ;;  %v3014_v13 = vadd.f32 %v3010_v48, %v4981_v31 }
 0xa07   :  { %3015 = vst [vmem:[#allocation8] sm:$0xff] %v3011_v61  ;;  %3016 = vst [vmem:[#allocation8 + $0x8] sm:$0xff] %v3012_v51 }
 0xa08   :  { %3017 = vst [vmem:[#allocation8 + $0x10] sm:$0xff] %v3013_v27  ;;  %3018 = vst [vmem:[#allocation8 + $0x18] sm:$0xff] %v3014_v13 }
 0xa09   :  { %4054 = shalt.err (!%p4051_p0)
}
 0xa0a   :  { %s4076_s6 = smov 128   ;;  %s4077_s18 = smov 8  }
 0xa0b   :  { %3030 = dma.vmem_to_hbm [thread:$0]  %s3025_s17, 512, %s5016_s9, [#allocation5], %s4076_s6, %s4076_s6, %s4077_s18  }
 0xa0c   :  { %4067 = dma.done.wait [#allocation5], 512  }
 0xa0d   :  { %4068 = vsyncadd [#allocation5], 4294966784 }
 0xa0e   :  { %3034 = vsyncpa [#allocation4], 1 }
 0xa0f   :  { %3035 = vsyncpa [#allocation7], 1 }
 0xa10   :  { %3036 = vsyncpa [#allocation5], 1 }

</bundles_post_ra>
